<compile_context>
chip_gen: v5e
topology: v5e:2x2
jax: 0.10.0
libtpu: 0.0.40
codegen_flags: <defaults>
</compile_context>

<pallas_src>
import math

import jax
import jax.numpy as jnp
from jax.experimental import pallas as pl
from jax.experimental.pallas import tpu as pltpu

# Pin f32 matmuls to full precision on TPU for both the kernel and the
# pure-JAX reference (otherwise default low-precision passes dominate the
# kernel-vs-reference difference).
jax.config.update("jax_default_matmul_precision", "highest")

# ---- LLMParams equivalent (small, deterministic, in-script) ----
BATCH       = 2
CONTEXT_LEN = 8                       # CD (== rope / mask context_length)
ATT_DIM     = 128                     # ED
NUM_HEADS   = 4                       # NH
NUM_KV      = 2                       # Nkv
HEAD_DIM    = ATT_DIM // NUM_HEADS    # 32
GROUP_SIZE  = NUM_HEADS // NUM_KV     # GS = 2
D_OUT       = NUM_HEADS * HEAD_DIM    # 128
GROUP_LANES = (1 + GROUP_SIZE + 1) * HEAD_DIM   # [K|Q0|Q1|V] = 128 lanes/group
ROPE_BASE   = 10000.0
QKV_BIAS    = False                   # q/k/v projections have no bias; out_proj does


def precompute_rope(context_length, head_dim, rope_base):
    # Exact port of the reference (exponent denominator is rope_dim, not head_dim).
    rope_dim = head_dim // 2
    j = jnp.arange(rope_dim, dtype=jnp.float32)
    thetas = 1.0 / rope_base ** (2.0 * j / rope_dim)
    positions = jnp.arange(context_length, dtype=jnp.float32)
    angles = positions[:, None] * thetas[None, :]
    angles = jnp.concatenate([angles, angles], axis=-1)          # (CL, head_dim)
    return jnp.cos(angles), jnp.sin(angles)                      # cos is dead (ref bug)


def fold_rope_rotation_into_weight(w, num_heads, head_dim):
    """Per-head columns w_eff s.t. x @ w_eff == (x @ w) + rotate_half(x @ w).

    rotate_half(t) = concat([-t_imag, t_real]).  Returns a list of per-head
    (ED, HD) column blocks so the caller can interleave them per KV group.
    """
    half = head_dim // 2
    cols = []
    for h in range(num_heads):
        wh = w[:, h * head_dim:(h + 1) * head_dim]
        wr, wi = wh[:, :half], wh[:, half:]
        cols.append(jnp.concatenate([wr - wi, wr + wi], axis=1))
    return cols


def prepare_params(wq, wk, wv, wo, bo, sin):
    """One-time host-side weight/buffer preparation (model-init equivalent)."""
    scale = 1.0 / math.sqrt(HEAD_DIM)
    q_cols = fold_rope_rotation_into_weight(wq * scale, NUM_HEADS, HEAD_DIM)
    k_cols = fold_rope_rotation_into_weight(wk, NUM_KV, HEAD_DIM)
    # Group-major, 128-lane-aligned column layout: [K_g | Q_g0 | Q_g1 | V_g].
    group_blocks = []
    for g in range(NUM_KV):
        blocks = [k_cols[g]]
        blocks += [q_cols[g * GROUP_SIZE + h] for h in range(GROUP_SIZE)]
        blocks.append(wv[:, g * HEAD_DIM:(g + 1) * HEAD_DIM])
        group_blocks.append(jnp.concatenate(blocks, axis=1))     # (ED, 128)
    wqkv = jnp.concatenate(group_blocks, axis=1)                 # (ED, 2*ED)

    # sin over the k + GROUP_SIZE q lane ranges of one group (v lanes untouched).
    sin_qk = jnp.tile(sin, (1, 1 + GROUP_SIZE))                  # (CD, (1+GS)*HD)

    # Additive causal mask for the GROUP_SIZE-row-packed score block.
    idx = jnp.arange(CONTEXT_LEN)
    causal = idx[None, :] > idx[:, None]                         # True above diagonal
    neg = jnp.where(causal, -jnp.inf, 0.0).astype(jnp.float32)   # (CD, CD)
    neg_mask = jnp.tile(neg, (GROUP_SIZE, 1))                    # (GS*CD, CD)
    return wqkv, wo, bo, sin_qk, neg_mask


def gqa_kernel(x_ref, wqkv_ref, wo_ref, bo_ref, sin_ref, mask_ref, out_ref, y_ref):
    cd = CONTEXT_LEN
    hd = HEAD_DIM

    # Fused QKV projection for this batch's (CD, ED) block; RoPE rotation and
    # the 1/sqrt(HD) score scale are pre-folded into the weights.
    qkv = jnp.dot(x_ref[...], wqkv_ref[...],
                  preferred_element_type=jnp.float32)            # (CD, 2*ED)
    sin_qk = sin_ref[...]                                        # (CD, (1+GS)*HD)
    neg_mask = mask_ref[...]                                     # (GS*CD, CD)

    # NUM_KV is tiny -> static unroll (convert to fori_loop if it grows).
    for g in range(NUM_KV):
        base = g * GROUP_LANES
        # One multiply applies the (buggy-faithful) "* sin" RoPE to K and both
        # Q heads of this group; V lanes are left untouched.
        qk = qkv[:, base:base + (1 + GROUP_SIZE) * hd] * sin_qk  # (CD, (1+GS)*HD)
        kg = qk[:, :hd]                                          # (CD, HD)
        vg = qkv[:, base + (1 + GROUP_SIZE) * hd:base + GROUP_LANES]  # (CD, HD)
        # Pack the GROUP_SIZE query heads sharing this KV group along rows.
        q_pack = jnp.concatenate(
            [qk[:, (1 + h) * hd:(2 + h) * hd] for h in range(GROUP_SIZE)],
            axis=0)                                              # (GS*CD, HD)
        # QK^T without an explicit transpose (contract last dims of both).
        s = jax.lax.dot_general(q_pack, kg, (((1,), (1,)), ((), ())),
                                preferred_element_type=jnp.float32)   # (GS*CD, CD)
        s = s + neg_mask                                         # -inf above diagonal
        m = jnp.max(s, axis=-1, keepdims=True)
        e = jnp.exp(s - m)
        p = e / jnp.sum(e, axis=-1, keepdims=True)               # exact softmax division
        y = jnp.dot(p, vg, preferred_element_type=jnp.float32)   # (GS*CD, HD)
        # Stage per-head results into the (CD, NH*HD) scratch slab.
        for hl in range(GROUP_SIZE):
            h = g * GROUP_SIZE + hl
            y_ref[:, h * hd:(h + 1) * hd] = y[hl * cd:(hl + 1) * cd]

    # Single K=128 output projection + bias, lane-dense (CD, 128) store.
    out_ref[...] = (jnp.dot(y_ref[...], wo_ref[...],
                            preferred_element_type=jnp.float32)
                    + bo_ref[...]).astype(out_ref.dtype)


def causal_mhga_forward(x, wqkv, wo, bo, sin_qk, neg_mask):
    bd, cd, ed = x.shape
    d_out = wo.shape[1]
    x2d = x.reshape(bd * cd, ed)
    out2d = pl.pallas_call(
        gqa_kernel,
        out_shape=jax.ShapeDtypeStruct((bd * cd, d_out), x.dtype),
        grid=(bd,),
        in_specs=[
            pl.BlockSpec((cd, ed), lambda b: (b, 0)),            # per-batch rows
            pl.BlockSpec(wqkv.shape, lambda b: (0, 0)),          # resident weights
            pl.BlockSpec(wo.shape, lambda b: (0, 0)),
            pl.BlockSpec(bo.shape, lambda b: (0, 0)),
            pl.BlockSpec(sin_qk.shape, lambda b: (0, 0)),
            pl.BlockSpec(neg_mask.shape, lambda b: (0, 0)),
        ],
        out_specs=pl.BlockSpec((cd, d_out), lambda b: (b, 0)),
        scratch_shapes=[pltpu.VMEM((cd, d_out), jnp.float32)],   # y slab
        compiler_params=pltpu.CompilerParams(
            dimension_semantics=("parallel",)),                  # 2nd TC on v7x
    )(x2d, wqkv, wo, bo, sin_qk, neg_mask)
    return out2d.reshape(bd, cd, d_out)


def reference_forward(x, wq, wk, wv, wo, bo, sin):
    # Pure-JAX mirror of the PyTorch forward (for validation).
    bd, cd, ed = x.shape
    q = x @ wq
    k = x @ wk
    v = x @ wv
    q = q.reshape(bd, cd, NUM_HEADS, HEAD_DIM).transpose(0, 2, 1, 3)
    k = k.reshape(bd, cd, NUM_KV, HEAD_DIM).transpose(0, 2, 1, 3)
    v = v.reshape(bd, cd, NUM_KV, HEAD_DIM).transpose(0, 2, 1, 3)

    def rope4(t):
        # Faithful to the reference compute_rope bug: local cos is overwritten
        # by sin before use, so result = t*sin + rotate_half(t)*sin.
        half = HEAD_DIM // 2
        tr, ti = t[..., :half], t[..., half:]
        t2 = jnp.concatenate([-ti, tr], axis=-1)
        s = sin[None, None, :cd, :]
        return t * s + t2 * s

    q = rope4(q)
    k = rope4(k)
    k = jnp.repeat(k, GROUP_SIZE, axis=1)
    v = jnp.repeat(v, GROUP_SIZE, axis=1)
    a = jnp.einsum('bhqd,bhkd->bhqk', q, k)
    mask = jnp.triu(jnp.ones((cd, cd), dtype=bool), k=1)
    a = jnp.where(mask[None, None], -jnp.inf, a)
    a = jax.nn.softmax(a / HEAD_DIM ** 0.5, axis=-1)
    y = jnp.einsum('bhqk,bhkd->bhqd', a, v)
    y = y.transpose(0, 2, 1, 3).reshape(bd, cd, NUM_HEADS * HEAD_DIM)
    # TODO(synk): reference has a typo (`self.head_dim`); intended head_dim used.
    return y @ wo + bo


if __name__ == "__main__":
    key = jax.random.PRNGKey(0)
    kx, kq, kk, kv, ko, kb = jax.random.split(key, 6)
    s = 0.02
    x = jax.random.normal(kx, (BATCH, CONTEXT_LEN, ATT_DIM), dtype=jnp.float32)
    wq = jax.random.normal(kq, (ATT_DIM, HEAD_DIM * NUM_HEADS), dtype=jnp.float32) * s
    wk = jax.random.normal(kk, (ATT_DIM, HEAD_DIM * NUM_KV), dtype=jnp.float32) * s
    wv = jax.random.normal(kv, (ATT_DIM, HEAD_DIM * NUM_KV), dtype=jnp.float32) * s
    wo = jax.random.normal(ko, (HEAD_DIM * NUM_HEADS, HEAD_DIM * NUM_HEADS),
                           dtype=jnp.float32) * s
    bo = jax.random.normal(kb, (1, HEAD_DIM * NUM_HEADS), dtype=jnp.float32) * s
    _cos, sin = precompute_rope(CONTEXT_LEN, HEAD_DIM, ROPE_BASE)  # cos dead (ref bug)

    wqkv, wo_p, bo_p, sin_qk, neg_mask = prepare_params(wq, wk, wv, wo, bo, sin)

    out = causal_mhga_forward(x, wqkv, wo_p, bo_p, sin_qk, neg_mask)
    out = jax.block_until_ready(out)

    ref = reference_forward(x, wq, wk, wv, wo, bo, sin)
    assert out.shape == (BATCH, CONTEXT_LEN, HEAD_DIM * NUM_HEADS)
    assert jnp.allclose(out, ref, atol=1e-4, rtol=1e-4), \
        float(jnp.max(jnp.abs(out - ref)))
    print("KERNEL_OK")
</pallas_src>

<mosaic_0001>
module attributes {stable_mosaic.version = 11 : i64} {
  func.func @gqa_kernel(%arg0: i32, %arg1: memref<8x128xf32, #tpu.memory_space<vmem>>, %arg2: memref<128x256xf32, #tpu.memory_space<vmem>>, %arg3: memref<128x128xf32, #tpu.memory_space<vmem>>, %arg4: memref<1x128xf32, #tpu.memory_space<vmem>>, %arg5: memref<8x96xf32, #tpu.memory_space<vmem>>, %arg6: memref<16x8xf32, #tpu.memory_space<vmem>>, %arg7: memref<8x128xf32, #tpu.memory_space<vmem>>, %arg8: memref<8x128xf32, #tpu.memory_space<vmem>>) attributes {dimension_semantics = [#tpu.dimension_semantics<parallel>], iteration_bounds = array<i64: 2>, scalar_prefetch = 0 : i64, scratch_operands = 1 : i64, tpu.core_type = #tpu.core_type<tc>, window_params = [{transform_indices = @transform_0, window_bounds = array<i64: 8, 128>}, {pipeline_mode = #tpu.pipeline_mode<synchronous>, transform_indices = @transform_1, window_bounds = array<i64: 128, 256>}, {pipeline_mode = #tpu.pipeline_mode<synchronous>, transform_indices = @transform_2, window_bounds = array<i64: 128, 128>}, {pipeline_mode = #tpu.pipeline_mode<synchronous>, transform_indices = @transform_3, window_bounds = array<i64: 1, 128>}, {pipeline_mode = #tpu.pipeline_mode<synchronous>, transform_indices = @transform_4, window_bounds = array<i64: 8, 96>}, {pipeline_mode = #tpu.pipeline_mode<synchronous>, transform_indices = @transform_5, window_bounds = array<i64: 16, 8>}, {transform_indices = @transform_6, window_bounds = array<i64: 8, 128>}]} {
    %c0 = arith.constant 0 : index
    %c0_0 = arith.constant 0 : index
    %0 = vector.load %arg1[%c0, %c0_0] : memref<8x128xf32, #tpu.memory_space<vmem>>, vector<8x128xf32>
    %c0_1 = arith.constant 0 : index
    %c0_2 = arith.constant 0 : index
    %1 = vector.load %arg2[%c0_1, %c0_2] : memref<128x256xf32, #tpu.memory_space<vmem>>, vector<128x256xf32>
    %cst = arith.constant dense<0.000000e+00> : vector<8x256xf32>
    %2 = tpu.matmul %0, %1, %cst {dimension_numbers = #tpu.dot_dimension_numbers<[1], [0], [0], [1], [0, 0, 1, 1], [], []>, precision = #tpu.contract_precision<fp32>} : vector<8x128xf32>, vector<128x256xf32>, vector<8x256xf32> -> vector<8x256xf32>
    %c0_3 = arith.constant 0 : index
    %c0_4 = arith.constant 0 : index
    %3 = vector.load %arg5[%c0_3, %c0_4] : memref<8x96xf32, #tpu.memory_space<vmem>>, vector<8x96xf32>
    %c0_5 = arith.constant 0 : index
    %c0_6 = arith.constant 0 : index
    %4 = vector.load %arg6[%c0_5, %c0_6] : memref<16x8xf32, #tpu.memory_space<vmem>>, vector<16x8xf32>
    %5 = vector.extract_strided_slice %2 {offsets = [0, 0], sizes = [8, 96], strides = [1, 1]} : vector<8x256xf32> to vector<8x96xf32>
    %6 = arith.mulf %5, %3 : vector<8x96xf32>
    %7 = vector.extract_strided_slice %6 {offsets = [0, 0], sizes = [8, 32], strides = [1, 1]} : vector<8x96xf32> to vector<8x32xf32>
    %8 = vector.extract_strided_slice %2 {offsets = [0, 96], sizes = [8, 32], strides = [1, 1]} : vector<8x256xf32> to vector<8x32xf32>
    %9 = vector.extract_strided_slice %6 {offsets = [0, 32], sizes = [8, 32], strides = [1, 1]} : vector<8x96xf32> to vector<8x32xf32>
    %10 = vector.extract_strided_slice %6 {offsets = [0, 64], sizes = [8, 32], strides = [1, 1]} : vector<8x96xf32> to vector<8x32xf32>
    %11 = tpu.concatenate %9, %10 in 0 : vector<8x32xf32>, vector<8x32xf32> -> vector<16x32xf32>
    %cst_7 = arith.constant dense<0.000000e+00> : vector<16x8xf32>
    %12 = tpu.matmul %11, %7, %cst_7 {dimension_numbers = #tpu.dot_dimension_numbers<[1], [1], [0], [0], [0, 0, 1, 0], [], []>, precision = #tpu.contract_precision<fp32>} : vector<16x32xf32>, vector<8x32xf32>, vector<16x8xf32> -> vector<16x8xf32>
    %13 = arith.addf %12, %4 : vector<16x8xf32>
    %cst_8 = arith.constant dense<0xFF800000> : vector<16xf32>
    %14 = vector.multi_reduction <maximumf>, %13, %cst_8 [1] : vector<16x8xf32> to vector<16xf32>
    %15 = vector.shape_cast %14 : vector<16xf32> to vector<16x1xf32>
    %16 = vector.broadcast %15 : vector<16x1xf32> to vector<16x8xf32>
    %17 = arith.subf %13, %16 : vector<16x8xf32>
    %18 = math.exp %17 : vector<16x8xf32>
    %cst_9 = arith.constant dense<0.000000e+00> : vector<16xf32>
    %19 = vector.multi_reduction <add>, %18, %cst_9 [1] : vector<16x8xf32> to vector<16xf32>
    %20 = vector.shape_cast %19 : vector<16xf32> to vector<16x1xf32>
    %21 = vector.broadcast %20 : vector<16x1xf32> to vector<16x8xf32>
    %22 = arith.divf %18, %21 : vector<16x8xf32>
    %cst_10 = arith.constant dense<0.000000e+00> : vector<16x32xf32>
    %23 = tpu.matmul %22, %8, %cst_10 {dimension_numbers = #tpu.dot_dimension_numbers<[1], [0], [0], [1], [0, 0, 1, 1], [], []>, precision = #tpu.contract_precision<fp32>} : vector<16x8xf32>, vector<8x32xf32>, vector<16x32xf32> -> vector<16x32xf32>
    %24 = vector.extract_strided_slice %23 {offsets = [0, 0], sizes = [8, 32], strides = [1, 1]} : vector<16x32xf32> to vector<8x32xf32>
    %c0_11 = arith.constant 0 : index
    %c0_12 = arith.constant 0 : index
    %25 = vector.load %arg8[%c0_11, %c0_12] : memref<8x128xf32, #tpu.memory_space<vmem>>, vector<8x32xf32>
    tpu.vector_store %arg8[%c0_11, %c0_12], %24 {strides = array<i32>} : memref<8x128xf32, #tpu.memory_space<vmem>>, vector<8x32xf32>,
    %26 = vector.extract_strided_slice %23 {offsets = [8, 0], sizes = [8, 32], strides = [1, 1]} : vector<16x32xf32> to vector<8x32xf32>
    %c0_13 = arith.constant 0 : index
    %c32 = arith.constant 32 : index
    %27 = vector.load %arg8[%c0_13, %c32] : memref<8x128xf32, #tpu.memory_space<vmem>>, vector<8x32xf32>
    tpu.vector_store %arg8[%c0_13, %c32], %26 {strides = array<i32>} : memref<8x128xf32, #tpu.memory_space<vmem>>, vector<8x32xf32>,
    %28 = vector.extract_strided_slice %2 {offsets = [0, 128], sizes = [8, 96], strides = [1, 1]} : vector<8x256xf32> to vector<8x96xf32>
    %29 = arith.mulf %28, %3 : vector<8x96xf32>
    %30 = vector.extract_strided_slice %29 {offsets = [0, 0], sizes = [8, 32], strides = [1, 1]} : vector<8x96xf32> to vector<8x32xf32>
    %31 = vector.extract_strided_slice %2 {offsets = [0, 224], sizes = [8, 32], strides = [1, 1]} : vector<8x256xf32> to vector<8x32xf32>
    %32 = vector.extract_strided_slice %29 {offsets = [0, 32], sizes = [8, 32], strides = [1, 1]} : vector<8x96xf32> to vector<8x32xf32>
    %33 = vector.extract_strided_slice %29 {offsets = [0, 64], sizes = [8, 32], strides = [1, 1]} : vector<8x96xf32> to vector<8x32xf32>
    %34 = tpu.concatenate %32, %33 in 0 : vector<8x32xf32>, vector<8x32xf32> -> vector<16x32xf32>
    %cst_14 = arith.constant dense<0.000000e+00> : vector<16x8xf32>
    %35 = tpu.matmul %34, %30, %cst_14 {dimension_numbers = #tpu.dot_dimension_numbers<[1], [1], [0], [0], [0, 0, 1, 0], [], []>, precision = #tpu.contract_precision<fp32>} : vector<16x32xf32>, vector<8x32xf32>, vector<16x8xf32> -> vector<16x8xf32>
    %36 = arith.addf %35, %4 : vector<16x8xf32>
    %cst_15 = arith.constant dense<0xFF800000> : vector<16xf32>
    %37 = vector.multi_reduction <maximumf>, %36, %cst_15 [1] : vector<16x8xf32> to vector<16xf32>
    %38 = vector.shape_cast %37 : vector<16xf32> to vector<16x1xf32>
    %39 = vector.broadcast %38 : vector<16x1xf32> to vector<16x8xf32>
    %40 = arith.subf %36, %39 : vector<16x8xf32>
    %41 = math.exp %40 : vector<16x8xf32>
    %cst_16 = arith.constant dense<0.000000e+00> : vector<16xf32>
    %42 = vector.multi_reduction <add>, %41, %cst_16 [1] : vector<16x8xf32> to vector<16xf32>
    %43 = vector.shape_cast %42 : vector<16xf32> to vector<16x1xf32>
    %44 = vector.broadcast %43 : vector<16x1xf32> to vector<16x8xf32>
    %45 = arith.divf %41, %44 : vector<16x8xf32>
    %cst_17 = arith.constant dense<0.000000e+00> : vector<16x32xf32>
    %46 = tpu.matmul %45, %31, %cst_17 {dimension_numbers = #tpu.dot_dimension_numbers<[1], [0], [0], [1], [0, 0, 1, 1], [], []>, precision = #tpu.contract_precision<fp32>} : vector<16x8xf32>, vector<8x32xf32>, vector<16x32xf32> -> vector<16x32xf32>
    %47 = vector.extract_strided_slice %46 {offsets = [0, 0], sizes = [8, 32], strides = [1, 1]} : vector<16x32xf32> to vector<8x32xf32>
    %c0_18 = arith.constant 0 : index
    %c64 = arith.constant 64 : index
    %48 = vector.load %arg8[%c0_18, %c64] : memref<8x128xf32, #tpu.memory_space<vmem>>, vector<8x32xf32>
    tpu.vector_store %arg8[%c0_18, %c64], %47 {strides = array<i32>} : memref<8x128xf32, #tpu.memory_space<vmem>>, vector<8x32xf32>,
    %49 = vector.extract_strided_slice %46 {offsets = [8, 0], sizes = [8, 32], strides = [1, 1]} : vector<16x32xf32> to vector<8x32xf32>
    %c0_19 = arith.constant 0 : index
    %c96 = arith.constant 96 : index
    %50 = vector.load %arg8[%c0_19, %c96] : memref<8x128xf32, #tpu.memory_space<vmem>>, vector<8x32xf32>
    tpu.vector_store %arg8[%c0_19, %c96], %49 {strides = array<i32>} : memref<8x128xf32, #tpu.memory_space<vmem>>, vector<8x32xf32>,
    %c0_20 = arith.constant 0 : index
    %c0_21 = arith.constant 0 : index
    %51 = vector.load %arg8[%c0_20, %c0_21] : memref<8x128xf32, #tpu.memory_space<vmem>>, vector<8x128xf32>
    %c0_22 = arith.constant 0 : index
    %c0_23 = arith.constant 0 : index
    %52 = vector.load %arg3[%c0_22, %c0_23] : memref<128x128xf32, #tpu.memory_space<vmem>>, vector<128x128xf32>
    %cst_24 = arith.constant dense<0.000000e+00> : vector<8x128xf32>
    %53 = tpu.matmul %51, %52, %cst_24 {dimension_numbers = #tpu.dot_dimension_numbers<[1], [0], [0], [1], [0, 0, 1, 1], [], []>, precision = #tpu.contract_precision<fp32>} : vector<8x128xf32>, vector<128x128xf32>, vector<8x128xf32> -> vector<8x128xf32>
    %c0_25 = arith.constant 0 : index
    %c0_26 = arith.constant 0 : index
    %54 = vector.load %arg4[%c0_25, %c0_26] : memref<1x128xf32, #tpu.memory_space<vmem>>, vector<1x128xf32>
    %55 = vector.broadcast %54 : vector<1x128xf32> to vector<8x128xf32>
    %56 = arith.addf %53, %55 : vector<8x128xf32>
    %c0_27 = arith.constant 0 : index
    %c0_28 = arith.constant 0 : index
    %57 = vector.load %arg7[%c0_27, %c0_28] : memref<8x128xf32, #tpu.memory_space<vmem>>, vector<8x128xf32>
    tpu.vector_store %arg7[%c0_27, %c0_28], %56 {strides = array<i32>} : memref<8x128xf32, #tpu.memory_space<vmem>>, vector<8x128xf32>,
    return
  }
  func.func @transform_0(%arg0: i32) -> (i32, i32) {
    %c0_i32 = arith.constant 0 : i32
    %c0_i32_0 = arith.constant 0 : i32
    return %arg0, %c0_i32 : i32, i32
  }
  func.func @transform_1(%arg0: i32) -> (i32, i32) {
    %c0_i32 = arith.constant 0 : i32
    %c0_i32_0 = arith.constant 0 : i32
    %c0_i32_1 = arith.constant 0 : i32
    return %c0_i32, %c0_i32_0 : i32, i32
  }
  func.func @transform_2(%arg0: i32) -> (i32, i32) {
    %c0_i32 = arith.constant 0 : i32
    %c0_i32_0 = arith.constant 0 : i32
    %c0_i32_1 = arith.constant 0 : i32
    return %c0_i32, %c0_i32_0 : i32, i32
  }
  func.func @transform_3(%arg0: i32) -> (i32, i32) {
    %c0_i32 = arith.constant 0 : i32
    %c0_i32_0 = arith.constant 0 : i32
    %c0_i32_1 = arith.constant 0 : i32
    return %c0_i32, %c0_i32_0 : i32, i32
  }
  func.func @transform_4(%arg0: i32) -> (i32, i32) {
    %c0_i32 = arith.constant 0 : i32
    %c0_i32_0 = arith.constant 0 : i32
    %c0_i32_1 = arith.constant 0 : i32
    return %c0_i32, %c0_i32_0 : i32, i32
  }
  func.func @transform_5(%arg0: i32) -> (i32, i32) {
    %c0_i32 = arith.constant 0 : i32
    %c0_i32_0 = arith.constant 0 : i32
    %c0_i32_1 = arith.constant 0 : i32
    return %c0_i32, %c0_i32_0 : i32, i32
  }
  func.func @transform_6(%arg0: i32) -> (i32, i32) {
    %c0_i32 = arith.constant 0 : i32
    %c0_i32_0 = arith.constant 0 : i32
    return %arg0, %c0_i32 : i32, i32
  }
}

</mosaic_0001>

<bundles_post_ra>
// kernel: tpu_custom_call.1
= control target key start
LH: loop header
LB: loop body
LE: loop exit
PB: predicated region body
PF: predicated region fallthrough
CT: control target
= control target key end

     0   :  { %11 = vsyncpa [#allocation4], 0  ;;  %s3526_s0 = inlined_call_operand.vmem [shape: f32[16,128], index: 0, kind: input, shape index: {}]   ;;  %s3527_s1 = inlined_call_operand.hbm [shape: f32[128,256], index: 1, kind: input, shape index: {}]   ;;  %s3528_s2 = inlined_call_operand.hbm [shape: f32[128,128], index: 2, kind: input, shape index: {}]   ;;  %s3529_s3 = inlined_call_operand.vmem [shape: f32[1,128], index: 3, kind: input, shape index: {}]   ;;  %s3530_s4 = inlined_call_operand.vmem [shape: f32[8,96], index: 4, kind: input, shape index: {}]   ;;  %s3531_s5 = inlined_call_operand.vmem [shape: f32[16,8], index: 5, kind: input, shape index: {}]   ;;  %s3532_s6 = inlined_call_operand.hbm [shape: f32[16,128], index: 6, kind: output, shape index: {}]  }
   0x1   :  { %12 = vsyncpa [#allocation7], 0 }
   0x2   :  { %13 = vsyncpa [#allocation5], 0 }
   0x3   :  { %15 = vsyncpa [#allocation5 + $0x1], 0  ;;  %s2602_s21 = smov 0   ;;  %s2604_s22 = smov 0  }
   0x4   :  { %s2606_s23 = smov 0   ;;  %s2608_s24 = smov 0  }
   0x5 LB: > { %s2623_s25 = sadd.s32 4294967295, %s2556_s24   ;;  %s2328_s26 = sadd.s32 4294967294, %s2556_s24   ;;  %s2556_s24 = sphi %s2608_s24, %s3541_s24   ;;  %s2552_s23 = sphi %s2606_s23, %s3540_s23   ;;  %s2548_s22 = sphi %s2604_s22, %s3539_s22   ;;  %s2544_s21 = sphi %s2602_s21, %s3538_s21  }
   0x6   : > { %s2627_s27 = sadd.s32 1, %s2556_s24   ;;  %s159_s28 = sadd.s32 1, %s2552_s23 }
   0x7   : > { %s156_s29 = ssub.s32 %s2556_s24, %s2627_s27  ;;  %p169_p0 = scmp.ne.s32.totalorder %s2552_s23, %s2548_s22 }
   0x8   : > { %p157_p1 = scmp.eq.s32.totalorder %s156_s29, 0  ;;  %p170_p2 = scmp.eq.s32.totalorder %s2623_s25, 1 }
   0x9   : > { %p175_p3 = scmp.ne.s32.totalorder %s2548_s22, %s2544_s21  ;;  %p176_p4 = scmp.eq.s32.totalorder %s2328_s26, 1 }
   0xa   : > { %s2638_s30 = scalar_select %p157_p1, %s2552_s23, %s159_s28  }
   0xb   : > { %p2640_p5 = por %p170_p2, %p169_p0  ;;  %p2644_p6 = por %p176_p4, %p175_p3 }
   0xc   : > { %p2329_p7 = scmp.ge.s32.totalorder %s2556_s24, 1  ;;  %p183_p8 = scmp.lt.s32.totalorder %s2556_s24, 3 }
   0xd   : > { %p2363_p9 = scmp.eq.s32.totalorder %s2623_s25, 0  ;;  %s194_s12 = sshll.u32 %s3527_s1, 4  ;;  %s195_s12 = int_to_ptr.hbm [resolvable:$true] %s194_s12 }
   0xe   : > { %p2651_p10 = pnand %p2329_p7, %p183_p8  ;;  %s2558_s13 = smov [#allocation3]  }
   0xf   : > { %s196_s14 = sshll.u32 %s2558_s13, 4  ;;  %s208_s17 = sshll.u32 %s3528_s2, 4  ;;  %s197_s14 = int_to_ptr.vmem [resolvable:$true] %s196_s14  ;;  %s209_s17 = int_to_ptr.hbm [resolvable:$true] %s208_s17 }
  0x10   : > { %p2352_p11 = pneg %p2651_p10  ;;  %s2559_s18 = smov 256  }
  0x11   : > { %s2560_s19 = smov 16   ;;  %s2561_s20 = smov [#allocation6]  }
  0x12   : > { %p2353_p12 = pnand %p2363_p9, %p2352_p11  ;;  %s210_s26 = sshll.u32 %s2561_s20, 4  ;;  %s211_s26 = int_to_ptr.vmem [resolvable:$true] %s210_s26 }
  0x13   : > { %s2562_s28 = smov 128   ;;  %s2563_s29 = smov 8  }
  0x14   : > { %2355 = dma.hbm_to_vmem [thread:$0]  (!%p2353_p12), %s195_s12, 4096, %s197_s14, [#allocation4], %s2559_s18, %s2559_s18, %s2560_s19  }
  0x15   : > { %2358 = dma.hbm_to_vmem [thread:$0]  (!%p2353_p12), %s209_s17, 2048, %s211_s26, [#allocation7], %s2562_s28, %s2562_s28, %s2563_s29  }
  0x16   : > { %242 = sbr.rel (%p2651_p10) target bundleno = 1785 (0x6f9), region = 44 }
  0x1b   : > { %2531 = dma.done.wait (%p2363_p9), [#allocation4], 4096  }
  0x1c   : > { %2533 = vsyncadd (%p2363_p9), [#allocation4], 4294963200 }
  0x1d   : > { %2535 = dma.done.wait (%p2363_p9), [#allocation7], 2048  }
  0x1e   : > { %2537 = vsyncadd (%p2363_p9), [#allocation7], 4294965248  ;;  %v312_v0 = vld [vmem:[#allocation3 + $0xf0] sm:$0xff]  ;;  %v310_v1 = vld [vmem:[#allocation3 + $0xe0] sm:$0xff]  ;;  %p277_p13 = scmp.lt.s32.totalorder %s2623_s25, 1  ;;  %vm1005_vm0 = vcmask 261120  }
  0x1f   : > { %v308_v2 = vld [vmem:[#allocation3 + $0xd0] sm:$0xff]  ;;  %v2675_v3 = vand.u32 4294901760, %v312_v0  ;;  %v2677_v4 = vand.u32 4294901760, %v310_v1  ;;  %v306_v6 = vld [vmem:[#allocation3 + $0xc0] sm:$0xff]  ;;  %s2564_s16 = smov 96   ;;  %vm1189_vm1 = vcmask 64512  }
  0x20   : > { %v2679_v5 = vand.u32 4294901760, %v308_v2  ;;  %v304_v7 = vld [vmem:[#allocation3 + $0xb0] sm:$0xff]  ;;  %v302_v8 = vld [vmem:[#allocation3 + $0xa0] sm:$0xff]  ;;  %v2681_v9 = vand.u32 4294901760, %v306_v6  ;;  %s2743_s9 = scalar_select %p277_p13, %s2623_s25, 1  ;;  %vm1430_vm10 = vcmask 523520  }
  0x21   : > { %v2683_v10 = vand.u32 4294901760, %v304_v7  ;;  %v2685_v11 = vand.u32 4294901760, %v302_v8  ;;  %v300_v12 = vld [vmem:[#allocation3 + $0x90] sm:$0xff]  ;;  %v298_v13 = vld [vmem:[#allocation3 + $0x80] sm:$0xff]  ;;  %315 = vmatpush.msra.mxu0 %v2675_v3  ;;  %v2689_v14 = vsub.f32 %v312_v0, %v2675_v3  ;;  %v2692_v15 = vsub.f32 %v310_v1, %v2677_v4  ;;  %511 = vmatpush.msra.mxu3 %v2675_v3  ;;  %s2565_s26 = smov 32   ;;  %s2566_s28 = smov 64  }
  0x22   : > { %v2695_v16 = vsub.f32 %v308_v2, %v2679_v5  ;;  %v2697_v17 = vand.u32 4294901760, %v300_v12  ;;  %v296_v18 = vld [vmem:[#allocation3 + $0x70] sm:$0xff]  ;;  %v2701_v19 = vsub.f32 %v306_v6, %v2681_v9  ;;  %v2714_v25 = vand.u32 4294901760, %v298_v13  ;;  %v294_v26 = vld [vmem:[#allocation3 + $0x60] sm:$0xff]  ;;  %s2337_s10 = sshll.u32 %s2743_s9, 3  ;;  %s2339_s12 = sshll.u32 %s2623_s25, 3 }
  0x23   : > { %v2704_v20 = vsub.f32 %v304_v7, %v2683_v10  ;;  %v2707_v21 = vsub.f32 %v302_v8, %v2685_v11  ;;  %317 = vmatpush.msra.mxu0 %v2677_v4  ;;  %v357_v22 = vand.u32 4294901760, %v2689_v14  ;;  %v363_v23 = vand.u32 4294901760, %v2692_v15  ;;  %458 = vmatpush.msra.mxu2 %v2689_v14  ;;  %v292_v36 = vld [vmem:[#allocation3 + $0x50] sm:$0xff]  ;;  %v290_v42 = vld [vmem:[#allocation3 + $0x40] sm:$0xff]  ;;  %s280_s13 = scalar_lea.vmem %s3526_s0, %s2337_s10  ;;  %s274_s10 = sand.u32 1, %s2548_s22  }
  0x24   : > { %v369_v24 = vand.u32 4294901760, %v2695_v16  ;;  %v375_v27 = vand.u32 4294901760, %v2701_v19  ;;  %v2718_v28 = vand.u32 4294901760, %v296_v18  ;;  %v2721_v29 = vsub.f32 %v300_v12, %v2697_v17  ;;  %513 = vmatpush.msra.mxu3 %v2677_v4  ;;  %v288_v47 = vld [vmem:[#allocation3 + $0x30] sm:$0xff]  ;;  %v286_v55 = vld [vmem:[#allocation3 + $0x20] sm:$0xff]  ;;  %v281_v7 = vld [vmem:[%s280_s13] sm:$0xff]  ;;  %s2242_s15 = scalar_lea.hbm %s3532_s6, %s2339_s12 }
  0x25   : > { %319 = vmatpush.msra.mxu0 %v2679_v5  ;;  %v358_v30 = vsub.f32 %v2689_v14, %v357_v22  ;;  %v364_v31 = vsub.f32 %v2692_v15, %v363_v23  ;;  %v381_v33 = vand.u32 4294901760, %v2704_v20  ;;  %461 = vmatpush.msra.mxu2 %v2692_v15  ;;  %v387_v34 = vand.u32 4294901760, %v2707_v21  ;;  %v284_v60 = vld [vmem:[#allocation3 + $0x10] sm:$0xff]  ;;  %v282_v1 = vld [vmem:[#allocation3] sm:$0xff]  ;;  %v313_v14 = vld [vmem:[#allocation3 + $0xf8] sm:$0xff]  ;;  %s2336_s11 = sshll.u32 %s274_s10, 3 }
  0x26   : > { %v370_v32 = vsub.f32 %v2695_v16, %v369_v24  ;;  %v2737_v35 = vand.u32 4294901760, %v294_v26  ;;  %515 = vmatpush.msra.mxu3 %v2679_v5  ;;  %v376_v39 = vsub.f32 %v2701_v19, %v375_v27  ;;  %v2750_v40 = vsub.f32 %v298_v13, %v2714_v25  ;;  %v311_v15 = vld [vmem:[#allocation3 + $0xe8] sm:$0xff]  ;;  %s2246_s18 = sshll.u32 %s2242_s15, 4  ;;  %s2232_s25 = scalar_lea.sflag [#allocation5], %s274_s10  ;;  %s2247_s18 = int_to_ptr.hbm [resolvable:$true] %s2246_s18 }
  0x27   : > { %v359_v37 = vand.u32 4294901760, %v358_v30  ;;  %321 = vmatpush.msra.mxu0 %v2681_v9  ;;  %v365_v38 = vand.u32 4294901760, %v364_v31  ;;  %464 = vmatpush.msra.mxu2 %v2695_v16  ;;  %v393_v41 = vand.u32 4294901760, %v2721_v29  ;;  %v382_v44 = vsub.f32 %v2704_v20, %v381_v33  ;;  %s2500_s19 = sshra.s32 %s2247_s18, 4  ;;  %s2506_s29 = scalar_lea.hbm %s3532_s6, 16  ;;  %s2501_s19 = int_to_ptr.hbm [resolvable:$true] %s2500_s19 }
  0x28   : > { %517 = vmatpush.msra.mxu3 %v2681_v9  ;;  %v371_v43 = vand.u32 4294901760, %v370_v32  ;;  %v2759_v45 = vand.u32 4294901760, %v292_v36  ;;  %v2762_v46 = vsub.f32 %v296_v18, %v2718_v28  ;;  %v388_v48 = vsub.f32 %v2707_v21, %v387_v34  ;;  %s2502_s20 = scalar_lea.hbm %s2501_s19, 8  ;;  %p2507_p3 = scmp.lt.s32.totalorder %s2501_s19, %s3532_s6 }
  0x29   : > { %360 = vmatpush.msra.mxu1 %v359_v37  ;;  %323 = vmatpush.msra.mxu0 %v2683_v10  ;;  %v377_v49 = vand.u32 4294901760, %v376_v39  ;;  %v399_v50 = vand.u32 4294901760, %v2750_v40  ;;  %v2772_v51 = vand.u32 4294901760, %v290_v42  ;;  %v2775_v52 = vsub.f32 %v294_v26, %v2737_v35  ;;  %p2503_p0 = scmp.ne.s32.totalorder %s2501_s19, %s2502_s20  ;;  %p2508_p4 = scmp.lt.s32.totalorder %s2506_s29, %s2502_s20 }
  0x2a   : > { %467 = vmatpush.msra.mxu2 %v2701_v19  ;;  %519 = vmatpush.msra.mxu3 %v2683_v10  ;;  %v394_v53 = vsub.f32 %v2721_v29, %v393_v41  ;;  %v2780_v54 = vand.u32 4294901760, %v288_v47  ;;  %v383_v56 = vand.u32 4294901760, %v382_v44  ;;  %v405_v57 = vand.u32 4294901760, %v2762_v46 }
  0x2b   : > { %366 = vmatpush.msra.mxu1 %v365_v38  ;;  %325 = vmatpush.msra.mxu0 %v2685_v11  ;;  %v2787_v58 = vsub.f32 %v292_v36, %v2759_v45  ;;  %v389_v59 = vand.u32 4294901760, %v388_v48  ;;  %v400_v61 = vsub.f32 %v2750_v40, %v399_v50  ;;  %v411_v62 = vand.u32 4294901760, %v2775_v52  ;;  %p2504_p1 = pnand %p2503_p0, %p2640_p5  ;;  %p2509_p7 = por %p2508_p4, %p2507_p3 }
  0x2c   : > { %470 = vmatpush.msra.mxu2 %v2704_v20  ;;  %521 = vmatpush.msra.mxu3 %v2685_v11  ;;  %v2799_v63 = vand.u32 4294901760, %v286_v55  ;;  %v2802_v0 = vsub.f32 %v290_v42, %v2772_v51  ;;  %v395_v2 = vand.u32 4294901760, %v394_v53  ;;  %v2805_v6 = vsub.f32 %v288_v47, %v2780_v54 }
  0x2d   : > { %372 = vmatpush.msra.mxu1 %v371_v43  ;;  %327 = vmatpush.msra.mxu0 %v2697_v17  ;;  %v406_v8 = vsub.f32 %v2762_v46, %v405_v57  ;;  %v417_v12 = vand.u32 4294901760, %v2787_v58  ;;  %v2814_v13 = vand.u32 4294901760, %v284_v60  ;;  %v2816_v18 = vand.u32 4294901760, %v281_v7  ;;  %p2505_p2 = pneg %p2504_p1 }
  0x2e   : > { %473 = vmatpush.msra.mxu2 %v2707_v21  ;;  %523 = vmatpush.msra.mxu3 %v2697_v17  ;;  %v2818_v26 = vand.u32 4294901760, %v282_v1  ;;  %v401_v30 = vand.u32 4294901760, %v400_v61  ;;  %v412_v31 = vsub.f32 %v2775_v52, %v411_v62  ;;  %v423_v32 = vand.u32 4294901760, %v2802_v0 }
  0x2f   : > { %378 = vmatpush.msra.mxu1 %v377_v49  ;;  %329 = vmatpush.msra.mxu0 %v2714_v25  ;;  %v2828_v36 = vsub.f32 %v286_v55, %v2799_v63  ;;  %v429_v37 = vand.u32 4294901760, %v2805_v6  ;;  %v407_v38 = vand.u32 4294901760, %v406_v8  ;;  %v418_v39 = vsub.f32 %v2787_v58, %v417_v12  ;;  %p2510_p8 = pnand %p2509_p7, %p2505_p2 }
  0x30   : > { %476 = vmatpush.msra.mxu2 %v2721_v29  ;;  %525 = vmatpush.msra.mxu3 %v2714_v25  ;;  %v2838_v42 = vsub.f32 %v284_v60, %v2814_v13  ;;  %v2841_v43 = vsub.f32 %v281_v7, %v2816_v18  ;;  %v413_v44 = vand.u32 4294901760, %v412_v31  ;;  %v424_v47 = vsub.f32 %v2802_v0, %v423_v32 }
  0x31   : > { %384 = vmatpush.msra.mxu1 %v383_v56  ;;  %331 = vmatpush.msra.mxu0 %v2718_v28  ;;  %v435_v48 = vand.u32 4294901760, %v2828_v36  ;;  %v2851_v49 = vsub.f32 %v282_v1, %v2818_v26  ;;  %v419_v53 = vand.u32 4294901760, %v418_v39  ;;  %v430_v55 = vsub.f32 %v2805_v6, %v429_v37 }
  0x32   : > { %479 = vmatpush.msra.mxu2 %v2750_v40  ;;  %527 = vmatpush.msra.mxu3 %v2718_v28  ;;  %v441_v56 = vand.u32 4294901760, %v2838_v42  ;;  %v425_v60 = vand.u32 4294901760, %v424_v47  ;;  %v2905_v16 = vand.u32 4294901760, %v311_v15  ;;  %v307_v47 = vld [vmem:[#allocation3 + $0xc8] sm:$0xff] }
  0x33   : > { %390 = vmatpush.msra.mxu1 %v389_v59  ;;  %333 = vmatpush.msra.mxu0 %v2737_v35  ;;  %v2861_v59 = vand.u32 4294901760, %v2841_v43  ;;  %v436_v61 = vsub.f32 %v2828_v36, %v435_v48  ;;  %v447_v1 = vand.u32 4294901760, %v2851_v49  ;;  %v2910_v19 = vand.u32 4294901760, %v307_v47  ;;  %v295_v40 = vld [vmem:[#allocation3 + $0x68] sm:$0xff] }
  0x34   : > { %482 = vmatpush.msra.mxu2 %v2762_v46  ;;  %529 = vmatpush.msra.mxu3 %v2737_v35  ;;  %v442_v7 = vsub.f32 %v2838_v42, %v441_v56 }
  0x35   : > { %396 = vmatpush.msra.mxu1 %v395_v2  ;;  %335 = vmatpush.msra.mxu0 %v2759_v45  ;;  %v431_v2 = vand.u32 4294901760, %v430_v55  ;;  %v349_v8 = vsub.f32 %v2841_v43, %v2861_v59  ;;  %v448_v31 = vsub.f32 %v2851_v49, %v447_v1  ;;  %v303_v55 = vld [vmem:[#allocation3 + $0xa8] sm:$0xff] }
  0x36   : > { %485 = vmatpush.msra.mxu2 %v2775_v52  ;;  %531 = vmatpush.msra.mxu3 %v2759_v45 }
  0x37   : > { %402 = vmatpush.msra.mxu1 %v401_v30  ;;  %337 = vmatpush.msra.mxu0 %v2772_v51  ;;  %v437_v30 = vand.u32 4294901760, %v436_v61  ;;  %v2888_v39 = vand.u32 4294901760, %v349_v8 }
  0x38   : > { %488 = vmatpush.msra.mxu2 %v2787_v58  ;;  %533 = vmatpush.msra.mxu3 %v2772_v51 }
  0x39   : > { %408 = vmatpush.msra.mxu1 %v407_v38  ;;  %339 = vmatpush.msra.mxu0 %v2780_v54  ;;  %v443_v38 = vand.u32 4294901760, %v442_v7  ;;  %v2930_v7 = vsub.f32 %v307_v47, %v2910_v19 }
  0x3a   : > { %491 = vmatpush.msra.mxu2 %v2802_v0  ;;  %535 = vmatpush.msra.mxu3 %v2780_v54 }
  0x3b   : > { %414 = vmatpush.msra.mxu1 %v413_v44  ;;  %341 = vmatpush.msra.mxu0 %v2799_v63  ;;  %v449_v44 = vand.u32 4294901760, %v448_v31  ;;  %v716_v31 = vand.u32 4294901760, %v2930_v7 }
  0x3c   : > { %494 = vmatpush.msra.mxu2 %v2805_v6  ;;  %537 = vmatpush.msra.mxu3 %v2799_v63 }
  0x3d   : > { %420 = vmatpush.msra.mxu1 %v419_v53  ;;  %343 = vmatpush.msra.mxu0 %v2814_v13  ;;  %v305_v53 = vld [vmem:[#allocation3 + $0xb8] sm:$0xff] }
  0x3e   : > { %497 = vmatpush.msra.mxu2 %v2828_v36  ;;  %539 = vmatpush.msra.mxu3 %v2814_v13 }
  0x3f   : > { %426 = vmatpush.msra.mxu1 %v425_v60  ;;  %345 = vmatpush.msra.mxu0 %v2818_v26  ;;  %v2914_v60 = vand.u32 4294901760, %v303_v55 }
  0x40   : > { %500 = vmatpush.msra.mxu2 %v2838_v42  ;;  %541 = vmatpush.msra.mxu3 %v2818_v26 }
  0x41   : > { %552 = vmatpush.msrb.mxu0 %v357_v22  ;;  %432 = vmatpush.msra.mxu1 %v431_v2  ;;  %v309_v22 = vld [vmem:[#allocation3 + $0xd8] sm:$0xff]  ;;  %v299_v2 = vld [vmem:[#allocation3 + $0x88] sm:$0xff] }
  0x42   : > { %503 = vmatpush.msra.mxu2 %v2851_v49  ;;  %545 = vmatmul.f32.vlgmr.msra.gmra.mxu3 %v2861_v59 }
  0x43   : > { %556 = vmatpush.msrb.mxu0 %v363_v23  ;;  %438 = vmatpush.msra.mxu1 %v437_v30  ;;  %v2903_v23 = vand.u32 4294901760, %v313_v14 }
  0x44   : > { %506 = vmatmul.f32.vlgmr.msra.gmra.mxu2 %v2841_v43  ;;  %351 = vmatmul.f32.vlgmr.msra.gmra.mxu0 %v2888_v39 }
  0x45   : > { %560 = vmatpush.msrb.mxu0 %v369_v24  ;;  %444 = vmatpush.msra.mxu1 %v443_v38  ;;  %v2907_v24 = vand.u32 4294901760, %v309_v22  ;;  %v2920_v20 = vsub.f32 %v313_v14, %v2903_v23  ;;  %v297_v38 = vld [vmem:[#allocation3 + $0x78] sm:$0xff] }
  0x46   : > { %656 = vmatpush.msrb.mxu2 %v2903_v23 }
  0x47   : > { %564 = vmatpush.msrb.mxu0 %v375_v27  ;;  %450 = vmatpush.msra.mxu1 %v449_v44  ;;  %v2912_v27 = vand.u32 4294901760, %v305_v53  ;;  %v2926_v61 = vsub.f32 %v309_v22, %v2907_v24  ;;  %v698_v21 = vand.u32 4294901760, %v2920_v20  ;;  %v2946_v44 = vsub.f32 %v303_v55, %v2914_v60 }
  0x48   : > { %452 = vmatmul.f32.vlgmr.msra.gmra.mxu1 %v2816_v18  ;;  %658 = vmatpush.msrb.mxu2 %v2905_v16 }
  0x49   : > { %619 = vmatpush.msrb.mxu1 %v2675_v3  ;;  %568 = vmatpush.msrb.mxu0 %v381_v33  ;;  %v301_v3 = vld [vmem:[#allocation3 + $0x98] sm:$0xff]  ;;  %v2923_v33 = vsub.f32 %v311_v15, %v2905_v16  ;;  %v3533_v30 = vand.u32 4294901760, %v2926_v61  ;;  %v2967_v15 = vand.u32 4294901760, %v297_v38  ;;  %v728_v55 = vand.u32 4294901760, %v2946_v44 }
  0x4a   : > { %v2940_v8 = vand.u32 4294901760, %v301_v3  ;;  %660 = vmatpush.msrb.mxu2 %v2907_v24 }
  0x4b   : > { %621 = vmatpush.msrb.mxu1 %v2677_v4  ;;  %572 = vmatpush.msrb.mxu0 %v387_v34  ;;  %v2933_v4 = vsub.f32 %v305_v53, %v2912_v27  ;;  %v704_v34 = vand.u32 4294901760, %v2923_v33  ;;  %v711_v14 = vsub.f32 %v2926_v61, %v3533_v30  ;;  %v717_v53 = vsub.f32 %v2930_v7, %v716_v31  ;;  %v293_v30 = vld [vmem:[#allocation3 + $0x58] sm:$0xff] }
  0x4c   : > { %v2970_v22 = vsub.f32 %v301_v3, %v2940_v8  ;;  %662 = vmatpush.msrb.mxu2 %v2910_v19 }
  0x4d   : > { %623 = vmatpush.msrb.mxu1 %v2679_v5  ;;  %576 = vmatpush.msrb.mxu0 %v393_v41  ;;  %v699_v5 = vsub.f32 %v2920_v20, %v698_v21  ;;  %v705_v29 = vsub.f32 %v2923_v33, %v704_v34  ;;  %v2957_v41 = vand.u32 4294901760, %v299_v2 }
  0x4e   : > { %664 = vmatpush.msrb.mxu2 %v2912_v27  ;;  %v734_v52 = vand.u32 4294901760, %v2970_v22 }
  0x4f   : > { %625 = vmatpush.msrb.mxu1 %v2681_v9  ;;  %580 = vmatpush.msrb.mxu0 %v399_v50  ;;  %v722_v9 = vand.u32 4294901760, %v2933_v4  ;;  %v700_v50 = vand.u32 4294901760, %v699_v5  ;;  %v706_v47 = vand.u32 4294901760, %v705_v29  ;;  %v2983_v46 = vsub.f32 %v299_v2, %v2957_v41  ;;  %v291_v5 = vld [vmem:[#allocation3 + $0x48] sm:$0xff] }
  0x50   : > { %666 = vmatpush.msrb.mxu2 %v2914_v60  ;;  %v718_v2 = vand.u32 4294901760, %v717_v53  ;;  %v729_v29 = vsub.f32 %v2946_v44, %v728_v55 }
  0x51   : > { %627 = vmatpush.msrb.mxu1 %v2683_v10  ;;  %584 = vmatpush.msrb.mxu0 %v405_v57  ;;  %v2980_v10 = vand.u32 4294901760, %v295_v40  ;;  %v712_v57 = vand.u32 4294901760, %v711_v14  ;;  %v723_v3 = vsub.f32 %v2933_v4, %v722_v9  ;;  %v289_v14 = vld [vmem:[#allocation3 + $0x38] sm:$0xff]  ;;  %v740_v58 = vand.u32 4294901760, %v2983_v46 }
  0x52   : > { %701 = vmatpush.msrb.mxu3 %v700_v50  ;;  %668 = vmatpush.msrb.mxu2 %v2940_v8  ;;  %v287_v50 = vld [vmem:[#allocation3 + $0x28] sm:$0xff]  ;;  %v3018_v0 = vand.u32 4294901760, %v289_v14  ;;  %v730_v53 = vand.u32 4294901760, %v729_v29 }
  0x53   : > { %629 = vmatpush.msrb.mxu1 %v2685_v11  ;;  %588 = vmatpush.msrb.mxu0 %v411_v62  ;;  %v2992_v11 = vand.u32 4294901760, %v293_v30  ;;  %v2996_v62 = vsub.f32 %v297_v38, %v2967_v15  ;;  %v724_v38 = vand.u32 4294901760, %v723_v3  ;;  %v3031_v6 = vand.u32 4294901760, %v287_v50 }
  0x54   : > { %707 = vmatpush.msrb.mxu3 %v706_v47  ;;  %670 = vmatpush.msrb.mxu2 %v2957_v41 }
  0x55   : > { %631 = vmatpush.msrb.mxu1 %v2697_v17  ;;  %592 = vmatpush.msrb.mxu0 %v417_v12  ;;  %v3005_v17 = vand.u32 4294901760, %v291_v5  ;;  %v3009_v12 = vsub.f32 %v295_v40, %v2980_v10  ;;  %v285_v40 = vld [vmem:[#allocation3 + $0x18] sm:$0xff]  ;;  %v3022_v47 = vsub.f32 %v293_v30, %v2992_v11  ;;  %v3061_v29 = vsub.f32 %v287_v50, %v3031_v6 }
  0x56   : > { %713 = vmatpush.msrb.mxu3 %v712_v57  ;;  %v283_v57 = vld [vmem:[#allocation3 + $0x8] sm:$0xff]  ;;  %672 = vmatpush.msrb.mxu2 %v2967_v15  ;;  %v3038_v3 = vand.u32 4294901760, %v285_v40 }
  0x57   : > { %633 = vmatpush.msrb.mxu1 %v2714_v25  ;;  %596 = vmatpush.msrb.mxu0 %v423_v32  ;;  %v735_v25 = vsub.f32 %v2970_v22, %v734_v52  ;;  %v746_v32 = vand.u32 4294901760, %v2996_v62  ;;  %v3035_v30 = vsub.f32 %v291_v5, %v3005_v17  ;;  %v3048_v5 = vsub.f32 %v289_v14, %v3018_v0 }
  0x58   : > { %719 = vmatpush.msrb.mxu3 %v718_v2  ;;  %674 = vmatpush.msrb.mxu2 %v2980_v10  ;;  %v3051_v2 = vand.u32 4294901760, %v283_v57  ;;  %v3071_v14 = vsub.f32 %v285_v40, %v3038_v3  ;;  %v776_v50 = vand.u32 4294901760, %v3061_v29 }
  0x59   : > { %635 = vmatpush.msrb.mxu1 %v2718_v28  ;;  %600 = vmatpush.msrb.mxu0 %v429_v37  ;;  %v741_v28 = vsub.f32 %v2983_v46, %v740_v58  ;;  %v752_v37 = vand.u32 4294901760, %v3009_v12  ;;  %v747_v36 = vsub.f32 %v2996_v62, %v746_v32 }
  0x5a   : > { %725 = vmatpush.msrb.mxu3 %v724_v38  ;;  %676 = vmatpush.msrb.mxu2 %v2992_v11 }
  0x5b   : > { %637 = vmatpush.msrb.mxu1 %v2737_v35  ;;  %604 = vmatpush.msrb.mxu0 %v435_v48  ;;  %v736_v35 = vand.u32 4294901760, %v735_v25  ;;  %v758_v48 = vand.u32 4294901760, %v3022_v47  ;;  %v753_v42 = vsub.f32 %v3009_v12, %v752_v37  ;;  %v3081_v25 = vsub.f32 %v283_v57, %v3051_v2 }
  0x5c   : > { %731 = vmatpush.msrb.mxu3 %v730_v53  ;;  %678 = vmatpush.msrb.mxu2 %v3005_v17  ;;  %v782_v53 = vand.u32 4294901760, %v3071_v14 }
  0x5d   : > { %639 = vmatpush.msrb.mxu1 %v2759_v45  ;;  %608 = vmatpush.msrb.mxu0 %v441_v56  ;;  %v742_v45 = vand.u32 4294901760, %v741_v28  ;;  %v764_v56 = vand.u32 4294901760, %v3035_v30  ;;  %v759_v49 = vsub.f32 %v3022_v47, %v758_v48  ;;  %v754_v38 = vand.u32 4294901760, %v753_v42 }
  0x5e   : > { %737 = vmatpush.msrb.mxu3 %v736_v35  ;;  %680 = vmatpush.msrb.mxu2 %v3018_v0  ;;  %v788_v57 = vand.u32 4294901760, %v3081_v25 }
  0x5f   : > { %641 = vmatpush.msrb.mxu1 %v2772_v51  ;;  %612 = vmatpush.msrb.mxu0 %v447_v1  ;;  %v748_v51 = vand.u32 4294901760, %v747_v36  ;;  %v770_v1 = vand.u32 4294901760, %v3048_v5  ;;  %v760_v40 = vand.u32 4294901760, %v759_v49 }
  0x60   : > { %614 = vmatmul.f32.vlgmr.msrb.gmra.mxu0 %v2816_v18  ;;  %743 = vmatpush.msrb.mxu3 %v742_v45  ;;  %v789_v45 = vsub.f32 %v3081_v25, %v788_v57 }
  0x61   : > { %643 = vmatpush.msrb.mxu1 %v2780_v54  ;;  %799 = vmatpush.msra.mxu0 %v2920_v20  ;;  %v765_v54 = vsub.f32 %v3035_v30, %v764_v56  ;;  %v3537_v20 = vand.u32 4294901760, %v2926_v61 }
  0x62   : > { %749 = vmatpush.msrb.mxu3 %v748_v51  ;;  %682 = vmatpush.msrb.mxu2 %v3031_v6 }
  0x63   : > { %645 = vmatpush.msrb.mxu1 %v2799_v63  ;;  %802 = vmatpush.msra.mxu0 %v2923_v33  ;;  %v771_v63 = vsub.f32 %v3048_v5, %v770_v1  ;;  %v766_v28 = vand.u32 4294901760, %v765_v54  ;;  %v3207_v54 = vld [vmem:[%s3531_s5] sm:$0xff] }
  0x64   : > { %755 = vmatpush.msrb.mxu3 %v754_v38  ;;  %684 = vmatpush.msrb.mxu2 %v3038_v3 }
  0x65   : > { %647 = vmatpush.msrb.mxu1 %v2814_v13  ;;  %805 = vmatpush.msra.mxu0 %v2926_v61  ;;  %v777_v13 = vsub.f32 %v3061_v29, %v776_v50  ;;  %v772_v35 = vand.u32 4294901760, %v771_v63  ;;  %v996_v61 = vld [vmem:[%s3530_s4] sm:$0xff]  ;;  %v3213_v63 = vld [vmem:[%s3531_s5 + $0x8] sm:$0xff] }
  0x66   : > { %761 = vmatpush.msrb.mxu3 %v760_v40  ;;  %686 = vmatpush.msrb.mxu2 %v3051_v2 }
  0x67   : > { %649 = vmatpush.msrb.mxu1 %v2818_v26  ;;  %v783_v26 = vsub.f32 %v3071_v14, %v782_v53  ;;  %808 = vmatpush.msra.mxu0 %v2930_v7  ;;  %v778_v36 = vand.u32 4294901760, %v777_v13 }
  0x68   : > { %651 = vmatmul.f32.vlgmr.msrb.gmra.mxu1 %v2816_v18  ;;  %767 = vmatpush.msrb.mxu3 %v766_v28 }
  0x69   : > { %852 = vmatpush.msra.mxu1 %v2903_v23  ;;  %893 = vmatpush.msra.mxu2 %v698_v21  ;;  %v784_v42 = vand.u32 4294901760, %v783_v26  ;;  %v790_v21 = vand.u32 4294901760, %v789_v45 }
  0x6a   : > { %811 = vmatpush.msra.mxu0 %v2933_v4  ;;  %773 = vmatpush.msrb.mxu3 %v772_v35 }
  0x6b   : > { %854 = vmatpush.msra.mxu1 %v2905_v16  ;;  %897 = vmatpush.msra.mxu2 %v704_v34 }
  0x6c   : > { %814 = vmatpush.msra.mxu0 %v2946_v44  ;;  %779 = vmatpush.msrb.mxu3 %v778_v36 }
  0x6d   : > { %856 = vmatpush.msra.mxu1 %v2907_v24  ;;  %901 = vmatpush.msra.mxu2 %v3537_v20 }
  0x6e   : > { %817 = vmatpush.msra.mxu0 %v2970_v22  ;;  %785 = vmatpush.msrb.mxu3 %v784_v42 }
  0x6f   : > { %858 = vmatpush.msra.mxu1 %v2910_v19  ;;  %905 = vmatpush.msra.mxu2 %v716_v31 }
  0x70   : > { %820 = vmatpush.msra.mxu0 %v2983_v46  ;;  %791 = vmatpush.msrb.mxu3 %v790_v21 }
  0x71   : > { %860 = vmatpush.msra.mxu1 %v2912_v27  ;;  %909 = vmatpush.msra.mxu2 %v722_v9 }
  0x72   : > { %960 = vmatpush.msra.mxu3 %v2903_v23  ;;  %823 = vmatpush.msra.mxu0 %v2996_v62 }
  0x73   : > { %862 = vmatpush.msra.mxu1 %v2914_v60  ;;  %913 = vmatpush.msra.mxu2 %v728_v55 }
  0x74   : > { %962 = vmatpush.msra.mxu3 %v2905_v16  ;;  %826 = vmatpush.msra.mxu0 %v3009_v12 }
  0x75   : > { %864 = vmatpush.msra.mxu1 %v2940_v8  ;;  %917 = vmatpush.msra.mxu2 %v734_v52 }
  0x76   : > { %964 = vmatpush.msra.mxu3 %v2907_v24  ;;  %829 = vmatpush.msra.mxu0 %v3022_v47 }
  0x77   : > { %866 = vmatpush.msra.mxu1 %v2957_v41  ;;  %921 = vmatpush.msra.mxu2 %v740_v58 }
  0x78   : > { %966 = vmatpush.msra.mxu3 %v2910_v19  ;;  %832 = vmatpush.msra.mxu0 %v3035_v30 }
  0x79   : > { %868 = vmatpush.msra.mxu1 %v2967_v15  ;;  %925 = vmatpush.msra.mxu2 %v746_v32 }
  0x7a   : > { %968 = vmatpush.msra.mxu3 %v2912_v27  ;;  %835 = vmatpush.msra.mxu0 %v3048_v5 }
  0x7b   : > { %870 = vmatpush.msra.mxu1 %v2980_v10  ;;  %929 = vmatpush.msra.mxu2 %v752_v37 }
  0x7c   : > { %970 = vmatpush.msra.mxu3 %v2914_v60  ;;  %838 = vmatpush.msra.mxu0 %v3061_v29 }
  0x7d   : > { %872 = vmatpush.msra.mxu1 %v2992_v11  ;;  %933 = vmatpush.msra.mxu2 %v758_v48 }
  0x7e   : > { %972 = vmatpush.msra.mxu3 %v2940_v8  ;;  %841 = vmatpush.msra.mxu0 %v3071_v14 }
  0x7f   : > { %874 = vmatpush.msra.mxu1 %v3005_v17  ;;  %937 = vmatpush.msra.mxu2 %v764_v56 }
  0x80   : > { %793 = vmatmul.f32.vlgmr.msrb.gmra.mxu3 %v2816_v18  ;;  %692 = vmatmul.f32.vlgmr.msrb.gmra.mxu2 %v2888_v39 }
  0x81   : > { %974 = vmatpush.msra.mxu3 %v2957_v41  ;;  %876 = vmatpush.msra.mxu1 %v3018_v0 }
  0x82   : > { %941 = vmatpush.msra.mxu2 %v770_v1  ;;  %844 = vmatpush.msra.mxu0 %v3081_v25 }
  0x83   : > { %976 = vmatpush.msra.mxu3 %v2967_v15  ;;  %878 = vmatpush.msra.mxu1 %v3031_v6 }
  0x84   : > { %945 = vmatpush.msra.mxu2 %v776_v50  ;;  %847 = vmatmul.f32.vlgmr.msra.gmra.mxu0 %v2841_v43 }
  0x85   : > { %978 = vmatpush.msra.mxu3 %v2980_v10  ;;  %880 = vmatpush.msra.mxu1 %v3038_v3 }
  0x86   : > { %949 = vmatpush.msra.mxu2 %v782_v53 }
  0x87   : > { %980 = vmatpush.msra.mxu3 %v2992_v11  ;;  %882 = vmatpush.msra.mxu1 %v3051_v2 }
  0x88   : > { %953 = vmatpush.msra.mxu2 %v788_v57  ;;  %886 = vmatmul.f32.vlgmr.msra.gmra.mxu1 %v2861_v59 }
  0x89   : > { %982 = vmatpush.msra.mxu3 %v3005_v17  ;;  %955 = vmatmul.f32.vlgmr.msra.gmra.mxu2 %v2816_v18 }
  0x8b   : > { %984 = vmatpush.msra.mxu3 %v3018_v0 }
  0x8d   : > { %986 = vmatpush.msra.mxu3 %v3031_v6 }
  0x8f   : > { %988 = vmatpush.msra.mxu3 %v3038_v3 }
  0x91   : > { %990 = vmatpush.msra.mxu3 %v3051_v2 }
  0x92   : > { %992 = vmatmul.f32.vlgmr.msra.gmra.mxu3 %v2816_v18 }
  0xc1   : > { %v352_v39 = vpop.f32.mrf.mxu0 }
  0xc5   : > { %v453_v43 = vpop.f32.mrf.mxu1  ;;  %v546_v19 = vpop.f32.mrf.mxu3 }
  0xc6   : > { %v454_v23 = vadd.f32 %v453_v43, %v352_v39 }
  0xc7   : > { %v507_v16 = vpop.f32.mrf.mxu2 }
  0xc8   : > { %v508_v24 = vadd.f32 %v507_v16, %v454_v23 }
  0xca   : > { %v547_v27 = vadd.f32 %v546_v19, %v508_v24 }
  0xdd   : > { %v615_v59 = vpop.f32.mrf.mxu0 }
  0xde   : > { %v616_v60 = vadd.f32 %v615_v59, %v547_v27 }
  0xe5   : > { %v652_v33 = vpop.f32.mrf.mxu1 }
  0xe6   : > { %v3192_v7 = vadd.f32 %v652_v33, %v616_v60 }
  0xe8   : > { %v999_v4 = vmul.f32 %v996_v61, %v3192_v7 }
  0xea   : > { %1001 = vrot.lane.b32.xlu0 %v999_v4, %s2564_s16  ;;  %v1010_v18 = vsel %vm1005_vm0, %v999_v4, 0 }
  0xeb   : > { %v1027_v34 = vand.u32 4294901760, %v1010_v18 }
  0xed   : > { %v1062_v8 = vsub.f32 %v1010_v18, %v1027_v34  ;;  %1028 = vmatpush.xpose.msrb.mxu2 %v1027_v34  ;;  %1179 = vmatpush.xpose.msrb.mxu1 %v1027_v34 }
  0xef   : > { %v1063_v31 = vand.u32 4294901760, %v1062_v8 }
  0xf1   : > { %1093 = vmatpush.xpose.msra.mxu2 %v1062_v8  ;;  %1153 = vmatpush.xpose.msrb.mxu0 %v1063_v31  ;;  %v1064_v44 = vsub.f32 %v1062_v8, %v1063_v31 }
  0xf3   : > { %v1065_v41 = vand.u32 4294901760, %v1064_v44 }
  0xf5   : > { %1066 = vmatpush.xpose.msrb.mxu3 %v1065_v41 }
  0xf9   : > { %1121 = vmatpush.xpose.msra.mxu3 %v1027_v34 }
 0x101   : > { %v848_v58 = vpop.f32.mrf.mxu0 }
 0x103   : > { %v794_v52 = vpop.f32.mrf.mxu3  ;;  %v693_v62 = vpop.f32.mrf.mxu2 }
 0x104   : > { %v795_v17 = vadd.f32 %v794_v52, %v693_v62 }
 0x105   : > { %v887_v0 = vpop.f32.mrf.mxu1 }
 0x106   : > { %v849_v12 = vadd.f32 %v848_v58, %v795_v17 }
 0x108   : > { %v888_v32 = vadd.f32 %v887_v0, %v849_v12 }
 0x10c   : > { %v956_v47 = vpop.f32.mrf.mxu2 }
 0x10d   : > { %v957_v6 = vadd.f32 %v956_v47, %v888_v32 }
 0x115   : > { %v993_v37 = vpop.f32.mrf.mxu3 }
 0x116   : > { %v3199_v30 = vadd.f32 %v993_v37, %v957_v6 }
 0x118   : > { %v1432_v3 = vmul.f32 %v996_v61, %v3199_v30 }
 0x11a   : > { %v1442_v41 = vsel %vm1005_vm0, %v1432_v3, 0 }
 0x15c   : > { %v1002_v9 = vpop.permute.xlu0 %1001 }
 0x15d   : > { %v1006_v15 = vsel %vm1005_vm0, %v1002_v9, 0  ;;  %1003 = vrot.lane.b32.xlu0 %v1002_v9, %s2564_s16  ;;  %v3222_v9 = vand.u32 4294901760, %v1442_v41 }
 0x15e   : > { %v1029_v22 = vand.u32 4294901760, %v1006_v15 }
 0x160   : > { %v1030_v55 = vsub.f32 %v1006_v15, %v1029_v22  ;;  %1068 = vmatmul.f32.vlgmr.msrb.gmra.mxu3 %v1029_v22  ;;  %1155 = vmatmul.f32.vlgmr.msrb.gmra.mxu0 %v1029_v22 }
 0x161   : > { %1181 = vmatmul.f32.vlgmr.msrb.gmra.mxu1 %v1029_v22  ;;  %v3229_v22 = vsub.f32 %v1442_v41, %v3222_v9 }
 0x162   : > { %v1031_v10 = vand.u32 4294901760, %v1030_v55 }
 0x164   : > { %v1032_v46 = vsub.f32 %v1030_v55, %v1031_v10 }
 0x165   : > { %1434 = vrot.lane.b32.xlu0 %v1432_v3, %s2564_s16 }
 0x166   : > { %v1033_v11 = vand.u32 4294901760, %v1032_v46 }
 0x168   : > { %1034 = vmatmul.f32.vlgmr.msrb.gmra.mxu2 %v1033_v11 }
 0x1cf   : > { %v1004_v48 = vpop.permute.xlu0 %1003 }
 0x1d0   : > { %v1008_v5 = vsel %vm1005_vm0, %v1004_v48, 0 }
 0x1d1   : > { %v1037_v2 = vand.u32 4294901760, %v1008_v5 }
 0x1d3   : > { %v1038_v56 = vsub.f32 %v1008_v5, %v1037_v2  ;;  %1072 = vmatmul.f32.gmra.mxu3 %v1037_v2  ;;  %1159 = vmatmul.f32.gmra.mxu0 %v1037_v2 }
 0x1d4   : > { %1185 = vmatmul.f32.gmra.mxu1 %v1037_v2 }
 0x1d5   : > { %v1039_v29 = vand.u32 4294901760, %v1038_v56 }
 0x1d7   : > { %v1040_v51 = vsub.f32 %v1038_v56, %v1039_v29  ;;  %v1435_v0 = vpop.permute.xlu0 %1434 }
 0x1d9   : > { %v1041_v49 = vand.u32 4294901760, %v1040_v51 }
 0x1db   : > { %1042 = vmatmul.f32.gmra.mxu2 %v1041_v49  ;;  %1125 = vmatmul.f32.vlgmr.msra.gmra.mxu3 %v1031_v10 }
 0x1dd   : > { %v1156_v26 = vpop.f32.mrf.mxu0 }
 0x1de   : > { %v1182_v45 = vpop.f32.mrf.mxu1 }
 0x1e3   : > { %1096 = vmatmul.f32.vlgmr.msra.gmra.mxu2 %v1030_v55  ;;  %1131 = vmatmul.f32.gmra.mxu3 %v1039_v29  ;;  %v1069_v1 = vpop.f32.mrf.mxu3  ;;  %v1495_v55 = vand.u32 4294901760, %v3229_v22 }
 0x1e5   : > { %v1496_v10 = vsub.f32 %v3229_v22, %v1495_v55 }
 0x1e7   : > { %v1497_v52 = vand.u32 4294901760, %v1496_v10 }
 0x1eb   : > { %1101 = vmatmul.f32.gmra.mxu2 %v1038_v56  ;;  %v1035_v14 = vpop.f32.mrf.mxu2 }
 0x1ec   : > { %v1036_v25 = vadd.f32 %v1035_v14, %v3207_v54 }
 0x1ee   : > { %v1070_v40 = vadd.f32 %v1069_v1, %v1036_v25  ;;  %v1438_v25 = vsel %vm1005_vm0, %v1435_v0, 0 }
 0x250   : > { %v1160_v24 = vpop.f32.mrf.mxu0 }
 0x251   : > { %v1186_v27 = vpop.f32.mrf.mxu1 }
 0x256   : > { %v1073_v38 = vpop.f32.mrf.mxu3 }
 0x25e   : > { %v1043_v50 = vpop.f32.mrf.mxu2  ;;  %v1126_v53 = vpop.f32.mrf.mxu3 }
 0x25f   : > { %v1044_v57 = vadd.f32 %v1043_v50, %v3213_v63 }
 0x261   : > { %v1074_v42 = vadd.f32 %v1073_v38, %v1044_v57 }
 0x266   : > { %v1097_v28 = vpop.f32.mrf.mxu2  ;;  %v1132_v23 = vpop.f32.mrf.mxu3 }
 0x267   : > { %v1098_v13 = vadd.f32 %v1097_v28, %v1070_v40 }
 0x269   : > { %v1127_v35 = vadd.f32 %v1126_v53, %v1098_v13 }
 0x26b   : > { %v1157_v36 = vadd.f32 %v1156_v26, %v1127_v35  ;;  %v1461_v26 = vand.u32 4294901760, %v1438_v25 }
 0x26d   : > { %v1183_v20 = vadd.f32 %v1182_v45, %v1157_v36 }
 0x26e   : > { %v1102_v21 = vpop.f32.mrf.mxu2 }
 0x26f   : > { %v1103_v43 = vadd.f32 %v1102_v21, %v1074_v42  ;;  %v1190_v39 = vsel %vm1189_vm1, %v1183_v20, -inf }
 0x270   : > { %1191 = vmax.xlane.f32.xlu1 %v1190_v39 }
 0x271   : > { %v1133_v16 = vadd.f32 %v1132_v23, %v1103_v43  ;;  %v1462_v23 = vsub.f32 %v1438_v25, %v1461_v26 }
 0x273   : > { %v1161_v19 = vadd.f32 %v1160_v24, %v1133_v16 }
 0x275   : > { %v1187_v59 = vadd.f32 %v1186_v27, %v1161_v19 }
 0x277   : > { %v1193_v60 = vsel %vm1189_vm1, %v1187_v59, -inf }
 0x278   : > { %1194 = vmax.xlane.f32.xlu1 %v1193_v60  ;;  %v1463_v60 = vand.u32 4294901760, %v1462_v23 }
 0x291   : > { %1239 = vrot.lane.b32.xlu1 %v3192_v7, %s2565_s26 }
 0x2e3   : > { %v1192_v33 = vpop.xlane.xlu1 %1191 }
 0x2e4   : > { %v1196_v61 = vsub.f32 %v1183_v20, %v1192_v33 }
 0x2e6   : > { %v1198_v4 = vmul.f32 1.442695, %v1196_v61 }
 0x2e8   : > { %2410 = vpow2.f32 %v1198_v4 }
 0x2eb   : > { %v1195_v18 = vpop.xlane.xlu1 %1194 }
 0x2ec   : > { %v1197_v34 = vsub.f32 %v1187_v59, %v1195_v18  ;;  %v1464_v18 = vsub.f32 %v1462_v23, %v1463_v60 }
 0x2ee   : > { %v2411_v8 = vpop.eup %2410  ;;  %v1200_v31 = vmul.f32 1.442695, %v1197_v34 }
 0x2ef   : > { %v1202_v44 = vsel %vm1189_vm1, %v2411_v8, 0.0 }
 0x2f0   : > { %2412 = vpow2.f32 %v1200_v31  ;;  %1203 = vadd.xlane.f32.xlu2 %v1202_v44  ;;  %v1465_v44 = vand.u32 4294901760, %v1464_v18 }
 0x2f6   : > { %v3224_v15 = vpop.eup %2412 }
 0x2f7   : > { %v1205_v7 = vsel %vm1189_vm1, %v3224_v15, 0.0 }
 0x2f8   : > { %1206 = vadd.xlane.f32.xlu2 %v1205_v7 }
 0x303   : > { %v1240_v46 = vpop.permute.xlu1 %1239 }
 0x304   : > { %v1263_v11 = vand.u32 4294901760, %v1240_v46 }
 0x306   : > { %v1298_v62 = vsub.f32 %v1240_v46, %v1263_v11  ;;  %1264 = vmatpush.msrb.mxu2 %v1263_v11  ;;  %1357 = vmatpush.msra.mxu1 %v1263_v11 }
 0x308   : > { %1498 = vmatpush.xpose.msrb.mxu1 %v1497_v52  ;;  %v1299_v17 = vand.u32 4294901760, %v1298_v62  ;;  %1329 = vmatpush.msra.mxu0 %v1298_v62 }
 0x30a   : > { %1460 = vmatpush.xpose.msrb.mxu0 %v3222_v9  ;;  %v1300_v58 = vsub.f32 %v1298_v62, %v1299_v17  ;;  %1389 = vmatpush.msra.mxu2 %v1299_v17 }
 0x30c   : > { %v1301_v12 = vand.u32 4294901760, %v1300_v58 }
 0x30e   : > { %1302 = vmatpush.msrb.mxu3 %v1301_v12 }
 0x310   : > { %1415 = vmatpush.msra.mxu3 %v1263_v11  ;;  %1436 = vrot.lane.b32.xlu2 %v1435_v0, %s2564_s16 }
 0x363   : > { %v1204_v32 = vpop.xlane.xlu2 %1203 }
 0x364   : > { %2414 = vrcp.f32 %v1204_v32  ;;  %v1219_v48 = vand.u32 2147483648, %v1204_v32  ;;  %v1217_v2 = vand.u32 2147483647, %v1204_v32  ;;  %vm1213_vm3 = vweird.f32 %v1204_v32 }
 0x366   : > { %v1220_v51 = vor.u32 1.1754944e-38, %v1219_v48  ;;  %vm1218_vm5 = vcmp.eq.f32.partialorder %v1217_v2, 8.507059e+37 }
 0x36a   : > { %v2415_v47 = vpop.eup %2414 }
 0x36b   : > { %v1209_v6 = vmul.f32 %v2415_v47, %v1204_v32  ;;  %v1207_v37 = vpop.xlane.xlu2 %1206  ;;  %vm1214_vm2 = vweird.f32 %v2415_v47 }
 0x36c   : > { %2416 = vrcp.f32 %v1207_v37  ;;  %vm1215_vm4 = vmor %vm1213_vm3, %vm1214_vm2  ;;  %v1234_v40 = vand.u32 2147483648, %v1207_v37  ;;  %v1232_v28 = vand.u32 2147483647, %v1207_v37  ;;  %vm1228_vm7 = vweird.f32 %v1207_v37 }
 0x36d   : > { %v1210_v3 = vsub.f32 1.0, %v1209_v6 }
 0x36e   : > { %v1235_v36 = vor.u32 1.1754944e-38, %v1234_v40  ;;  %vm1233_vm9 = vcmp.eq.f32.partialorder %v1232_v28, 8.507059e+37 }
 0x36f   : > { %v1211_v5 = vmul.f32 %v2415_v47, %v1210_v3 }
 0x371   : > { %v1212_v56 = vadd.f32 %v2415_v47, %v1211_v5 }
 0x372   : > { %v2417_v29 = vpop.eup %2416 }
 0x373   : > { %v1216_v49 = vsel %vm1215_vm4, %v2415_v47, %v1212_v56  ;;  %v1224_v1 = vmul.f32 %v2417_v29, %v1207_v37  ;;  %vm1229_vm6 = vweird.f32 %v2417_v29  ;;  %v1437_v21 = vpop.permute.xlu2 %1436  ;;  %vm1866_vm4 = vcmask 1048320  }
 0x374   : > { %v1221_v14 = vsel %vm1218_vm5, %v1220_v51, %v1216_v49  ;;  %vm1230_vm8 = vmor %vm1228_vm7, %vm1229_vm6  ;;  %v1440_v24 = vsel %vm1005_vm0, %v1437_v21, 0 }
 0x375   : > { %v1225_v38 = vsub.f32 1.0, %v1224_v1  ;;  %v1222_v50 = vmul.f32 %v2411_v8, %v1221_v14  ;;  %v1469_v33 = vand.u32 4294901760, %v1440_v24 }
 0x377   : > { %v1226_v53 = vmul.f32 %v2417_v29, %v1225_v38  ;;  %v1243_v13 = vsel %vm1189_vm1, %v1222_v50, 0  ;;  %v1470_v34 = vsub.f32 %v1440_v24, %v1469_v33 }
 0x378   : > { %v1265_v57 = vand.u32 4294901760, %v1243_v13 }
 0x379   : > { %v1227_v35 = vadd.f32 %v2417_v29, %v1226_v53  ;;  %v1471_v41 = vand.u32 4294901760, %v1470_v34 }
 0x37a   : > { %1304 = vmatmul.f32.vlgmr.msrb.gmra.mxu3 %v1265_v57  ;;  %v1266_v45 = vsub.f32 %v1243_v13, %v1265_v57 }
 0x37b   : > { %v1231_v42 = vsel %vm1230_vm8, %v2417_v29, %v1227_v35  ;;  %1553 = vmatpush.xpose.msrb.mxu3 %v3222_v9 }
 0x37c   : > { %v1236_v20 = vsel %vm1233_vm9, %v1235_v36, %v1231_v42  ;;  %1332 = vmatmul.f32.vlgmr.msra.gmra.mxu0 %v1266_v45  ;;  %v1267_v43 = vand.u32 4294901760, %v1266_v45 }
 0x37d   : > { %1585 = vmatpush.xpose.msra.mxu0 %v1495_v55  ;;  %v1237_v39 = vmul.f32 %v3224_v15, %v1236_v20 }
 0x37e   : > { %1361 = vmatmul.f32.vlgmr.msra.gmra.mxu1 %v1267_v43  ;;  %v1268_v16 = vsub.f32 %v1266_v45, %v1267_v43 }
 0x37f   : > { %1611 = vmatpush.xpose.msra.mxu1 %v3222_v9  ;;  %v1246_v19 = vsel %vm1189_vm1, %v1237_v39, 0  ;;  %v1472_v9 = vsub.f32 %v1470_v34, %v1471_v41 }
 0x380   : > { %v1269_v27 = vand.u32 4294901760, %v1268_v16  ;;  %v1273_v59 = vand.u32 4294901760, %v1246_v19 }
 0x381   : > { %v1473_v15 = vand.u32 4294901760, %v1472_v9 }
 0x382   : > { %1270 = vmatmul.f32.vlgmr.msrb.gmra.mxu2 %v1269_v27  ;;  %1308 = vmatmul.f32.gmra.mxu3 %v1273_v59  ;;  %v1274_v61 = vsub.f32 %v1246_v19, %v1273_v59 }
 0x383   : > { %1525 = vmatpush.xpose.msrb.mxu2 %v3229_v22 }
 0x384   : > { %1337 = vmatmul.f32.gmra.mxu0 %v1274_v61  ;;  %v1275_v4 = vand.u32 4294901760, %v1274_v61 }
 0x386   : > { %1367 = vmatmul.f32.gmra.mxu1 %v1275_v4  ;;  %v1276_v8 = vsub.f32 %v1274_v61, %v1275_v4 }
 0x388   : > { %v1277_v31 = vand.u32 4294901760, %v1276_v8 }
 0x38a   : > { %1278 = vmatmul.f32.gmra.mxu2 %v1277_v31  ;;  %1417 = vmatmul.f32.vlgmr.msra.gmra.mxu3 %v1265_v57 }
 0x38c   : > { %1466 = vmatmul.f32.vlgmr.msrb.gmra.mxu0 %v1465_v44 }
 0x38e   : > { %1500 = vmatmul.f32.vlgmr.msrb.gmra.mxu1 %v1461_v26 }
 0x392   : > { %1391 = vmatmul.f32.vlgmr.msra.gmra.mxu2 %v1265_v57  ;;  %1421 = vmatmul.f32.gmra.mxu3 %v1273_v59 }
 0x394   : > { %1474 = vmatmul.f32.gmra.mxu0 %v1473_v15 }
 0x396   : > { %1504 = vmatmul.f32.gmra.mxu1 %v1469_v33 }
 0x39a   : > { %1395 = vmatmul.f32.gmra.mxu2 %v1273_v59  ;;  %1557 = vmatmul.f32.vlgmr.msrb.gmra.mxu3 %v1463_v60 }
 0x39c   : > { %1587 = vmatmul.f32.vlgmr.msra.gmra.mxu0 %v1461_v26 }
 0x39e   : > { %1613 = vmatmul.f32.vlgmr.msra.gmra.mxu1 %v1461_v26 }
 0x3a2   : > { %1528 = vmatmul.f32.vlgmr.msrb.gmra.mxu2 %v1462_v23  ;;  %1563 = vmatmul.f32.gmra.mxu3 %v1471_v41 }
 0x3a4   : > { %1591 = vmatmul.f32.gmra.mxu0 %v1469_v33 }
 0x3a6   : > { %1617 = vmatmul.f32.gmra.mxu1 %v1469_v33 }
 0x3aa   : > { %1533 = vmatmul.f32.gmra.mxu2 %v1470_v34 }
 0x3f9   : > { %v1333_v22 = vpop.f32.mrf.mxu0 }
 0x3fb   : > { %v1362_v55 = vpop.f32.mrf.mxu1 }
 0x3fd   : > { %v1305_v7 = vpop.f32.mrf.mxu3 }
 0x401   : > { %v1338_v11 = vpop.f32.mrf.mxu0 }
 0x403   : > { %v1368_v52 = vpop.f32.mrf.mxu1 }
 0x405   : > { %v1271_v10 = vpop.f32.mrf.mxu2  ;;  %v1309_v46 = vpop.f32.mrf.mxu3 }
 0x406   : > { %v1306_v62 = vadd.f32 %v1305_v7, %v1271_v10 }
 0x408   : > { %v1334_v58 = vadd.f32 %v1333_v22, %v1306_v62 }
 0x409   : > { %v1467_v0 = vpop.f32.mrf.mxu0 }
 0x40a   : > { %v1363_v32 = vadd.f32 %v1362_v55, %v1334_v58  ;;  %v1468_v29 = vadd.f32 %v1467_v0, %v3207_v54 }
 0x40b   : > { %v1501_v47 = vpop.f32.mrf.mxu1 }
 0x40c   : > { %v1502_v51 = vadd.f32 %v1501_v47, %v1468_v29 }
 0x40d   : > { %v1279_v17 = vpop.f32.mrf.mxu2  ;;  %v1418_v12 = vpop.f32.mrf.mxu3 }
 0x411   : > { %v1475_v5 = vpop.f32.mrf.mxu0 }
 0x412   : > { %v1476_v50 = vadd.f32 %v1475_v5, %v3213_v63  ;;  %v1310_v63 = vadd.f32 %v1309_v46, %v1279_v17 }
 0x413   : > { %v1505_v56 = vpop.f32.mrf.mxu1 }
 0x414   : > { %v1506_v28 = vadd.f32 %v1505_v56, %v1476_v50  ;;  %v1339_v39 = vadd.f32 %v1338_v11, %v1310_v63 }
 0x415   : > { %v1392_v6 = vpop.f32.mrf.mxu2  ;;  %v1422_v48 = vpop.f32.mrf.mxu3 }
 0x416   : > { %v1393_v37 = vadd.f32 %v1392_v6, %v1363_v32  ;;  %v1369_v23 = vadd.f32 %v1368_v52, %v1339_v39  ;;  %v1881_v39 = vld [vmem:[#allocation6 + $0x60] sm:$0xff] }
 0x418   : > { %v1419_v3 = vadd.f32 %v1418_v12, %v1393_v37 }
 0x419   : > { %v1588_v38 = vpop.f32.mrf.mxu0 }
 0x41a   : > { %1425 = vst.msk [vmem:[#allocation2] sm:$0xff] %vm1005_vm0, %v1419_v3 }
 0x41b   : > { %v1614_v40 = vpop.f32.mrf.mxu1 }
 0x41d   : > { %v1396_v2 = vpop.f32.mrf.mxu2  ;;  %v1558_v49 = vpop.f32.mrf.mxu3 }
 0x41e   : > { %v1397_v16 = vadd.f32 %v1396_v2, %v1369_v23  ;;  %v1880_v23 = vld [vmem:[#allocation6 + $0x58] sm:$0xff] }
 0x420   : > { %v1423_v24 = vadd.f32 %v1422_v48, %v1397_v16  ;;  %v1879_v16 = vld [vmem:[#allocation6 + $0x50] sm:$0xff] }
 0x421   : > { %v1592_v54 = vpop.f32.mrf.mxu0 }
 0x423   : > { %v1618_v20 = vpop.f32.mrf.mxu1 }
 0x425   : > { %v1529_v1 = vpop.f32.mrf.mxu2  ;;  %v1564_v36 = vpop.f32.mrf.mxu3 }
 0x426   : > { %v1530_v14 = vadd.f32 %v1529_v1, %v1502_v51 }
 0x428   : > { %v1559_v25 = vadd.f32 %v1558_v49, %v1530_v14 }
 0x42a   : > { %v1589_v53 = vadd.f32 %v1588_v38, %v1559_v25 }
 0x42c   : > { %v1615_v13 = vadd.f32 %v1614_v40, %v1589_v53 }
 0x42d   : > { %v1534_v57 = vpop.f32.mrf.mxu2 }
 0x42e   : > { %v1535_v35 = vadd.f32 %v1534_v57, %v1506_v28  ;;  %v1621_v26 = vsel %vm1189_vm1, %v1615_v13, -inf }
 0x42f   : > { %1622 = vmax.xlane.f32.xlu0 %v1621_v26 }
 0x430   : > { %v1565_v45 = vadd.f32 %v1564_v36, %v1535_v35 }
 0x432   : > { %v1593_v42 = vadd.f32 %v1592_v54, %v1565_v45  ;;  %v1884_v54 = vld [vmem:[#allocation6 + $0x78] sm:$0xff] }
 0x434   : > { %v1619_v21 = vadd.f32 %v1618_v20, %v1593_v42  ;;  %v1883_v42 = vld [vmem:[#allocation6 + $0x70] sm:$0xff]  ;;  %v1882_v20 = vld [vmem:[#allocation6 + $0x68] sm:$0xff] }
 0x435   : > { %v3259_v63 = vand.u32 4294901760, %v1882_v20 }
 0x436   : > { %v1624_v43 = vsel %vm1189_vm1, %v1619_v21, -inf }
 0x437   : > { %1625 = vmax.xlane.f32.xlu2 %v1624_v43  ;;  %v3257_v43 = vand.u32 4294901760, %v1883_v42 }
 0x44f   : > { %1427 = vrot.lane.b32.xlu2 %v1423_v24, %s2565_s26  ;;  %v3261_v24 = vand.u32 4294901760, %v1881_v39 }
 0x4a2   : > { %v1623_v19 = vpop.xlane.xlu0 %1622 }
 0x4a3   : > { %v1627_v27 = vsub.f32 %v1615_v13, %v1623_v19  ;;  %v3263_v19 = vand.u32 4294901760, %v1880_v23 }
 0x4a5   : > { %v1629_v59 = vmul.f32 1.442695, %v1627_v27  ;;  %v3265_v27 = vand.u32 4294901760, %v1879_v16 }
 0x4a7   : > { %2418 = vpow2.f32 %v1629_v59  ;;  %v1878_v59 = vld [vmem:[#allocation6 + $0x48] sm:$0xff] }
 0x4aa   : > { %v1626_v60 = vpop.xlane.xlu2 %1625 }
 0x4ab   : > { %v1628_v33 = vsub.f32 %v1619_v21, %v1626_v60  ;;  %v3255_v21 = vand.u32 4294901760, %v1884_v54 }
 0x4ad   : > { %v2419_v61 = vpop.eup %2418  ;;  %v1631_v4 = vmul.f32 1.442695, %v1628_v33  ;;  %v3268_v60 = vsub.f32 %v1884_v54, %v3255_v21  ;;  %v3271_v33 = vsub.f32 %v1883_v42, %v3257_v43 }
 0x4ae   : > { %v1633_v18 = vsel %vm1189_vm1, %v2419_v61, 0.0 }
 0x4af   : > { %2420 = vpow2.f32 %v1631_v4  ;;  %1634 = vadd.xlane.f32.xlu1 %v1633_v18  ;;  %v3277_v4 = vand.u32 4294901760, %v1878_v59  ;;  %v3281_v18 = vsub.f32 %v1881_v39, %v3261_v24 }
 0x4b2   : > { %v1428_v34 = vpop.permute.xlu2 %1427 }
 0x4b3   : > { %1431 = vst.msk [vmem:[#allocation2] sm:$0xff] %vm1430_vm10, %v1428_v34  ;;  %v3284_v34 = vsub.f32 %v1880_v23, %v3263_v19  ;;  %v1870_v23 = vld [vmem:[#allocation6 + $0x8] sm:$0xff] }
 0x4b5   : > { %v2421_v8 = vpop.eup %2420 }
 0x4b6   : > { %v1636_v31 = vsel %vm1189_vm1, %v2421_v8, 0.0 }
 0x4b7   : > { %1637 = vadd.xlane.f32.xlu0 %v1636_v31  ;;  %v1877_v31 = vld [vmem:[#allocation6 + $0x40] sm:$0xff] }
 0x4cb   : > { %1670 = vrot.lane.b32.xlu0 %v3199_v30, %s2565_s26 }
 0x522   : > { %v1635_v44 = vpop.xlane.xlu1 %1634 }
 0x523   : > { %2422 = vrcp.f32 %v1635_v44  ;;  %v1650_v22 = vand.u32 2147483648, %v1635_v44  ;;  %v1648_v10 = vand.u32 2147483647, %v1635_v44  ;;  %vm1644_vm12 = vweird.f32 %v1635_v44 }
 0x525   : > { %v1651_v52 = vor.u32 1.1754944e-38, %v1650_v22  ;;  %vm1649_vm14 = vcmp.eq.f32.partialorder %v1648_v10, 8.507059e+37  ;;  %v1950_v22 = vand.u32 4294901760, %v3281_v18  ;;  %v3299_v10 = vsub.f32 %v1878_v59, %v3277_v4 }
 0x529   : > { %v2423_v41 = vpop.eup %2422 }
 0x52a   : > { %v1640_v9 = vmul.f32 %v2423_v41, %v1635_v44  ;;  %v1638_v15 = vpop.xlane.xlu0 %1637  ;;  %vm1645_vm11 = vweird.f32 %v2423_v41 }
 0x52b   : > { %2424 = vrcp.f32 %v1638_v15  ;;  %vm1646_vm13 = vmor %vm1644_vm12, %vm1645_vm11  ;;  %v1665_v0 = vand.u32 2147483648, %v1638_v15  ;;  %v1663_v47 = vand.u32 2147483647, %v1638_v15  ;;  %vm1659_vm0 = vweird.f32 %v1638_v15 }
 0x52c   : > { %v1641_v7 = vsub.f32 1.0, %v1640_v9  ;;  %v1932_v9 = vand.u32 4294901760, %v3268_v60 }
 0x52d   : > { %v1666_v48 = vor.u32 1.1754944e-38, %v1665_v0  ;;  %vm1664_vm3 = vcmp.eq.f32.partialorder %v1663_v47, 8.507059e+37  ;;  %v1874_v47 = vld [vmem:[#allocation6 + $0x28] sm:$0xff] }
 0x52e   : > { %v1642_v55 = vmul.f32 %v2423_v41, %v1641_v7 }
 0x530   : > { %v1643_v46 = vadd.f32 %v2423_v41, %v1642_v55  ;;  %v1956_v55 = vand.u32 4294901760, %v3284_v34 }
 0x531   : > { %v2425_v11 = vpop.eup %2424 }
 0x532   : > { %v1647_v62 = vsel %vm1646_vm13, %v2423_v41, %v1643_v46  ;;  %v1655_v17 = vmul.f32 %v2425_v11, %v1638_v15  ;;  %vm1660_vm15 = vweird.f32 %v2425_v11  ;;  %v1938_v15 = vand.u32 4294901760, %v3271_v33 }
 0x533   : > { %v1652_v30 = vsel %vm1649_vm14, %v1651_v52, %v1647_v62  ;;  %vm1661_vm2 = vmor %vm1659_vm0, %vm1660_vm15  ;;  %v1933_v46 = vsub.f32 %v3268_v60, %v1932_v9  ;;  %v3312_v62 = vand.u32 4294901760, %v1877_v31 }
 0x534   : > { %v1653_v58 = vmul.f32 %v2419_v61, %v1652_v30  ;;  %v1656_v12 = vsub.f32 1.0, %v1655_v17  ;;  %v3274_v61 = vsub.f32 %v1882_v20, %v3259_v63  ;;  %v1876_v30 = vld [vmem:[#allocation6 + $0x38] sm:$0xff] }
 0x536   : > { %v1657_v32 = vmul.f32 %v2425_v11, %v1656_v12  ;;  %v1674_v6 = vsel %vm1189_vm1, %v1653_v58, 0  ;;  %v1944_v7 = vand.u32 4294901760, %v3274_v61  ;;  %v1875_v58 = vld [vmem:[#allocation6 + $0x30] sm:$0xff]  ;;  %v1934_v12 = vand.u32 4294901760, %v1933_v46 }
 0x537   : > { %v1696_v37 = vand.u32 4294901760, %v1674_v6 }
 0x538   : > { %v1658_v3 = vadd.f32 %v2425_v11, %v1657_v32  ;;  %v1945_v52 = vsub.f32 %v3274_v61, %v1944_v7  ;;  %v1951_v32 = vsub.f32 %v3281_v18, %v1950_v22 }
 0x539   : > { %v1697_v5 = vsub.f32 %v1674_v6, %v1696_v37  ;;  %v1873_v6 = vld [vmem:[#allocation6 + $0x20] sm:$0xff] }
 0x53a   : > { %v1662_v2 = vsel %vm1661_vm2, %v2425_v11, %v1658_v3  ;;  %v1939_v11 = vsub.f32 %v3271_v33, %v1938_v15  ;;  %v1957_v3 = vsub.f32 %v3284_v34, %v1956_v55 }
 0x53b   : > { %v1698_v56 = vand.u32 4294901760, %v1697_v5  ;;  %v1667_v29 = vsel %vm1664_vm3, %v1666_v48, %v1662_v2  ;;  %v1968_v48 = vand.u32 4294901760, %v3299_v10  ;;  %v1946_v2 = vand.u32 4294901760, %v1945_v52 }
 0x53c   : > { %v1668_v51 = vmul.f32 %v2421_v8, %v1667_v29  ;;  %v3287_v8 = vsub.f32 %v1879_v16, %v3265_v27  ;;  %v1940_v0 = vand.u32 4294901760, %v1939_v11  ;;  %v3331_v29 = vand.u32 4294901760, %v1876_v30 }
 0x53d   : > { %v1671_v49 = vpop.permute.xlu0 %1670  ;;  %v1699_v1 = vsub.f32 %v1697_v5, %v1698_v56 }
 0x53e   : > { %v1694_v14 = vand.u32 4294901760, %v1671_v49  ;;  %v1677_v38 = vsel %vm1189_vm1, %v1668_v51, 0  ;;  %v1962_v17 = vand.u32 4294901760, %v3287_v8  ;;  %v3333_v51 = vand.u32 4294901760, %v1875_v58 }
 0x53f   : > { %v1700_v50 = vand.u32 4294901760, %v1699_v1  ;;  %v1704_v25 = vand.u32 4294901760, %v1677_v38  ;;  %v3338_v1 = vand.u32 4294901760, %v1874_v47  ;;  %vm1860_vm1 = vcmask 785920  }
 0x540   : > { %v1729_v40 = vsub.f32 %v1671_v49, %v1694_v14  ;;  %1695 = vmatpush.msra.mxu2 %v1694_v14  ;;  %1788 = vmatpush.msrb.mxu1 %v1694_v14  ;;  %v1963_v49 = vsub.f32 %v3287_v8, %v1962_v17 }
 0x541   : > { %1701 = vmatmul.f32.vlgmr.msra.gmra.mxu2 %v1700_v50  ;;  %1792 = vmatmul.f32.vlgmr.msrb.gmra.mxu1 %v1698_v56  ;;  %v1705_v53 = vsub.f32 %v1677_v38, %v1704_v25  ;;  %v3328_v56 = vsub.f32 %v1877_v31, %v3312_v62  ;;  %v1872_v38 = vld [vmem:[#allocation6 + $0x18] sm:$0xff]  ;;  %v3359_v42 = vsub.f32 %v1874_v47, %v3338_v1 }
 0x542   : > { %v1730_v28 = vand.u32 4294901760, %v1729_v40  ;;  %1760 = vmatpush.msrb.mxu0 %v1729_v40  ;;  %1935 = vmatpush.msra.mxu1 %v1934_v12  ;;  %v3361_v20 = vand.u32 4294901760, %v1872_v38  ;;  %v1964_v16 = vand.u32 4294901760, %v1963_v49 }
 0x543   : > { %1763 = vmatmul.f32.vlgmr.msrb.gmra.mxu0 %v1697_v5  ;;  %v1706_v13 = vand.u32 4294901760, %v1705_v53  ;;  %v1992_v12 = vand.u32 4294901760, %v3359_v42 }
 0x544   : > { %v1731_v57 = vsub.f32 %v1729_v40, %v1730_v28  ;;  %1820 = vmatpush.msrb.mxu2 %v1730_v28  ;;  %1890 = vmatpush.msra.mxu0 %v3255_v21  ;;  %v1974_v40 = vand.u32 4294901760, %v3328_v56  ;;  %v3350_v28 = vsub.f32 %v1875_v58, %v3333_v51 }
 0x545   : > { %v1707_v35 = vsub.f32 %v1705_v53, %v1706_v13  ;;  %1941 = vmatpush.msra.mxu1 %v1940_v0  ;;  %v3384_v0 = vsub.f32 %v1872_v38, %v3361_v20 }
 0x546   : > { %v1732_v26 = vand.u32 4294901760, %v1731_v57  ;;  %1892 = vmatpush.msra.mxu0 %v3257_v43  ;;  %2033 = vmatpush.msra.mxu2 %v3268_v60  ;;  %v1969_v57 = vsub.f32 %v3299_v10, %v1968_v48  ;;  %v1975_v59 = vsub.f32 %v3328_v56, %v1974_v40  ;;  %v1986_v31 = vand.u32 4294901760, %v3350_v28 }
 0x547   : > { %v1708_v36 = vand.u32 4294901760, %v1707_v35  ;;  %v1871_v35 = vld [vmem:[#allocation6 + $0x10] sm:$0xff]  ;;  %1947 = vmatpush.msra.mxu1 %v1946_v2 }
 0x548   : > { %1733 = vmatpush.msra.mxu3 %v1732_v26  ;;  %1894 = vmatpush.msra.mxu0 %v3259_v63  ;;  %v1970_v52 = vand.u32 4294901760, %v1969_v57  ;;  %v2004_v57 = vand.u32 4294901760, %v3384_v0 }
 0x549   : > { %1709 = vmatmul.f32.gmra.mxu2 %v1708_v36  ;;  %1735 = vmatmul.f32.vlgmr.msra.gmra.mxu3 %v1696_v37 }
 0x54a   : > { %1798 = vmatmul.f32.gmra.mxu1 %v1706_v13  ;;  %1846 = vmatpush.msrb.mxu3 %v1694_v14  ;;  %v3340_v14 = vand.u32 4294901760, %v1873_v6 }
 0x54b   : > { %1768 = vmatmul.f32.gmra.mxu0 %v1705_v53  ;;  %2036 = vmatpush.msra.mxu2 %v3271_v33  ;;  %v3346_v53 = vsub.f32 %v1876_v30, %v3331_v29  ;;  %v1869_v30 = vld [vmem:[#allocation6] sm:$0xff] }
 0x54c   : > { %2086 = vmatpush.msra.mxu3 %v3255_v21  ;;  %1896 = vmatpush.msra.mxu0 %v3261_v24  ;;  %v3364_v39 = vsub.f32 %v1873_v6, %v3340_v14  ;;  %v3398_v49 = vand.u32 4294901760, %v1869_v30 }
 0x54d   : > { %2039 = vmatpush.msra.mxu2 %v3274_v61  ;;  %v1980_v54 = vand.u32 4294901760, %v3346_v53  ;;  %v2409_v61 = vld [vmem:[%s3529_s3] ss:$0 sm:$0xff] }
 0x54e   : > { %2088 = vmatpush.msra.mxu3 %v3257_v43  ;;  %1898 = vmatpush.msra.mxu0 %v3263_v19  ;;  %v1998_v47 = vand.u32 4294901760, %v3364_v39 }
 0x54f   : > { %2042 = vmatpush.msra.mxu2 %v3281_v18  ;;  %v1981_v58 = vsub.f32 %v3346_v53, %v1980_v54 }
 0x550   : > { %2090 = vmatpush.msra.mxu3 %v3259_v63  ;;  %1900 = vmatpush.msra.mxu0 %v3265_v27 }
 0x551   : > { %1739 = vmatmul.f32.gmra.mxu3 %v1704_v25  ;;  %1822 = vmatmul.f32.vlgmr.msrb.gmra.mxu2 %v1696_v37 }
 0x552   : > { %2092 = vmatpush.msra.mxu3 %v3261_v24  ;;  %2045 = vmatpush.msra.mxu2 %v3284_v34 }
 0x553   : > { %1902 = vmatpush.msra.mxu0 %v3277_v4 }
 0x554   : > { %2094 = vmatpush.msra.mxu3 %v3263_v19  ;;  %2048 = vmatpush.msra.mxu2 %v3287_v8 }
 0x555   : > { %1904 = vmatpush.msra.mxu0 %v3312_v62 }
 0x556   : > { %2096 = vmatpush.msra.mxu3 %v3265_v27  ;;  %2051 = vmatpush.msra.mxu2 %v3299_v10 }
 0x557   : > { %1906 = vmatpush.msra.mxu0 %v3331_v29 }
 0x558   : > { %2098 = vmatpush.msra.mxu3 %v3277_v4  ;;  %2054 = vmatpush.msra.mxu2 %v3328_v56 }
 0x559   : > { %1826 = vmatmul.f32.gmra.mxu2 %v1704_v25  ;;  %1848 = vmatmul.f32.vlgmr.msrb.gmra.mxu3 %v1696_v37 }
 0x55a   : > { %2100 = vmatpush.msra.mxu3 %v3312_v62  ;;  %1908 = vmatpush.msra.mxu0 %v3333_v51 }
 0x55b   : > { %2057 = vmatpush.msra.mxu2 %v3346_v53 }
 0x55c   : > { %2102 = vmatpush.msra.mxu3 %v3331_v29  ;;  %1910 = vmatpush.msra.mxu0 %v3338_v1 }
 0x55d   : > { %2060 = vmatpush.msra.mxu2 %v3350_v28 }
 0x55e   : > { %1912 = vmatpush.msra.mxu0 %v3340_v14  ;;  %2104 = vmatpush.msra.mxu3 %v3333_v51 }
 0x55f   : > { %2063 = vmatpush.msra.mxu2 %v3359_v42 }
 0x560   : > { %1914 = vmatpush.msra.mxu0 %v3361_v20  ;;  %2106 = vmatpush.msra.mxu3 %v3338_v1 }
 0x561   : > { %1852 = vmatmul.f32.gmra.mxu3 %v1704_v25  ;;  %v1952_v25 = vand.u32 4294901760, %v1951_v32  ;;  %2066 = vmatpush.msra.mxu2 %v3364_v39 }
 0x562   : > { %2108 = vmatpush.msra.mxu3 %v3340_v14 }
 0x563   : > { %1953 = vmatpush.msra.mxu1 %v1952_v25  ;;  %v1982_v25 = vand.u32 4294901760, %v1981_v58  ;;  %2069 = vmatpush.msra.mxu2 %v3384_v0 }
 0x564   : > { %2110 = vmatpush.msra.mxu3 %v3361_v20 }
 0x5be   : > { %v1793_v26 = vpop.f32.mrf.mxu1 }
 0x5c0   : > { %v1764_v5 = vpop.f32.mrf.mxu0 }
 0x5c4   : > { %v1702_v45 = vpop.f32.mrf.mxu2 }
 0x5c8   : > { %v1769_v6 = vpop.f32.mrf.mxu0 }
 0x5cc   : > { %v3289_v44 = vpop.f32.mrf.mxu2  ;;  %v1736_v41 = vpop.f32.mrf.mxu3 }
 0x5cd   : > { %v1737_v37 = vadd.f32 %v1736_v41, %v1702_v45  ;;  %v1958_v45 = vand.u32 4294901760, %v1957_v3  ;;  %v3373_v41 = vand.u32 4294901760, %v1871_v35  ;;  %v1976_v3 = vand.u32 4294901760, %v1975_v59 }
 0x5cf   : > { %v1765_v13 = vadd.f32 %v1764_v5, %v1737_v37  ;;  %1959 = vmatpush.msra.mxu1 %v1958_v45  ;;  %v1987_v5 = vsub.f32 %v3350_v28, %v1986_v31  ;;  %v3396_v2 = vsub.f32 %v1871_v35, %v3373_v41  ;;  %1916 = vmatpush.msra.mxu0 %v3373_v41 }
 0x5d0   : > { %2112 = vmatpush.msra.mxu3 %v3373_v41 }
 0x5d1   : > { %v1794_v11 = vadd.f32 %v1793_v26, %v1765_v13  ;;  %1965 = vmatpush.msra.mxu1 %v1964_v16  ;;  %v1993_v13 = vsub.f32 %v3359_v42, %v1992_v12  ;;  %v1799_v26 = vpop.f32.mrf.mxu1  ;;  %v1988_v45 = vand.u32 4294901760, %v1987_v5  ;;  %v1999_v16 = vsub.f32 %v3364_v39, %v1998_v47  ;;  %2072 = vmatpush.msra.mxu2 %v3396_v2 }
 0x5d2   : > { %v2010_v59 = vand.u32 4294901760, %v3396_v2 }
 0x5d3   : > { %1971 = vmatpush.msra.mxu1 %v1970_v52  ;;  %v2005_v52 = vsub.f32 %v3384_v0, %v2004_v57 }
 0x5d4   : > { %v1740_v50 = vpop.f32.mrf.mxu3  ;;  %v1823_v36 = vpop.f32.mrf.mxu2 }
 0x5d5   : > { %v1741_v46 = vadd.f32 %v1740_v50, %v3289_v44  ;;  %v3386_v44 = vand.u32 4294901760, %v1870_v23  ;;  %v1824_v32 = vadd.f32 %v1823_v36, %v1794_v11  ;;  %1977 = vmatpush.msra.mxu1 %v1976_v3  ;;  %v1994_v11 = vand.u32 4294901760, %v1993_v13 }
 0x5d7   : > { %v1770_v38 = vadd.f32 %v1769_v6, %v1741_v46  ;;  %v3408_v35 = vsub.f32 %v1870_v23, %v3386_v44  ;;  %v3417_v46 = vsub.f32 %v1869_v30, %v3398_v49  ;;  %1983 = vmatpush.msra.mxu1 %v1982_v25  ;;  %v2000_v6 = vand.u32 4294901760, %v1999_v16  ;;  %1918 = vmatpush.msra.mxu0 %v3386_v44 }
 0x5d8   : > { %2114 = vmatpush.msra.mxu3 %v3386_v44 }
 0x5d9   : > { %v1800_v23 = vadd.f32 %v1799_v26, %v1770_v38  ;;  %v2016_v58 = vand.u32 4294901760, %v3408_v35  ;;  %1989 = vmatpush.msra.mxu1 %v1988_v45  ;;  %v2022_v3 = vand.u32 4294901760, %v3417_v46  ;;  %v2006_v38 = vand.u32 4294901760, %v2005_v52  ;;  %1920 = vmatpush.msra.mxu0 %v3398_v49 }
 0x5da   : > { %2075 = vmatpush.msra.mxu2 %v3408_v35  ;;  %2116 = vmatpush.msra.mxu3 %v3398_v49 }
 0x5db   : > { %1995 = vmatpush.msra.mxu1 %v1994_v11  ;;  %v2023_v13 = vsub.f32 %v3417_v46, %v2022_v3  ;;  %2127 = vmatpush.msrb.mxu0 %v1932_v9 }
 0x5dc   : > { %v1849_v37 = vpop.f32.mrf.mxu3  ;;  %v1827_v36 = vpop.f32.mrf.mxu2  ;;  %2078 = vmatpush.msra.mxu2 %v3417_v46 }
 0x5dd   : > { %v1850_v50 = vadd.f32 %v1849_v37, %v1824_v32  ;;  %v1828_v32 = vadd.f32 %v1827_v36, %v1800_v23  ;;  %v2011_v37 = vsub.f32 %v3396_v2, %v2010_v59  ;;  %2001 = vmatpush.msra.mxu1 %v2000_v6  ;;  %2131 = vmatpush.msrb.mxu0 %v1938_v15  ;;  %v2024_v36 = vand.u32 4294901760, %v2023_v13 }
 0x5df   : > { %1857 = vrot.lane.b32.xlu1 %v1850_v50, %s2566_s28  ;;  %v2017_v50 = vsub.f32 %v3408_v35, %v2016_v58  ;;  %v2012_v25 = vand.u32 4294901760, %v2011_v37  ;;  %2007 = vmatpush.msra.mxu1 %v2006_v38 }
 0x5e0   : > { %2135 = vmatpush.msrb.mxu0 %v1944_v7 }
 0x5e1   : > { %v2018_v26 = vand.u32 4294901760, %v2017_v50  ;;  %2013 = vmatpush.msra.mxu1 %v2012_v25 }
 0x5e2   : > { %2139 = vmatpush.msrb.mxu0 %v1950_v22 }
 0x5e3   : > { %2019 = vmatpush.msra.mxu1 %v2018_v26 }
 0x5e4   : > { %v1853_v30 = vpop.f32.mrf.mxu3  ;;  %2143 = vmatpush.msrb.mxu0 %v1956_v55 }
 0x5e5   : > { %v1854_v5 = vadd.f32 %v1853_v30, %v1828_v32  ;;  %2025 = vmatpush.msra.mxu1 %v2024_v36 }
 0x5e6   : > { %2147 = vmatpush.msrb.mxu0 %v1962_v17 }
 0x5e7   : > { %1863 = vrot.lane.b32.xlu0 %v1854_v5, %s2564_s16  ;;  %2194 = vmatpush.msrb.mxu1 %v3255_v21  ;;  %s276_s16 = scalar_lea.vmem [#allocation8], %s2336_s11 }
 0x5e8   : > { %2151 = vmatpush.msrb.mxu0 %v1968_v48  ;;  %s2244_s17 = sshll.u32 %s276_s16, 4  ;;  %s2245_s17 = int_to_ptr.vmem [resolvable:$true] %s2244_s17 }
 0x5e9   : > { %2196 = vmatpush.msrb.mxu1 %v3257_v43 }
 0x5ea   : > { %2155 = vmatpush.msrb.mxu0 %v1974_v40 }
 0x5eb   : > { %2198 = vmatpush.msrb.mxu1 %v3259_v63 }
 0x5ec   : > { %2159 = vmatpush.msrb.mxu0 %v1980_v54 }
 0x5ed   : > { %2200 = vmatpush.msrb.mxu1 %v3261_v24 }
 0x5ee   : > { %2163 = vmatpush.msrb.mxu0 %v1986_v31 }
 0x5ef   : > { %2202 = vmatpush.msrb.mxu1 %v3263_v19 }
 0x5f0   : > { %2167 = vmatpush.msrb.mxu0 %v1992_v12 }
 0x5f1   : > { %2204 = vmatpush.msrb.mxu1 %v3265_v27 }
 0x5f2   : > { %2171 = vmatpush.msrb.mxu0 %v1998_v47 }
 0x5f3   : > { %2206 = vmatpush.msrb.mxu1 %v3277_v4 }
 0x5f4   : > { %2175 = vmatpush.msrb.mxu0 %v2004_v57 }
 0x5f5   : > { %2208 = vmatpush.msrb.mxu1 %v3312_v62 }
 0x5f6   : > { %2179 = vmatpush.msrb.mxu0 %v2010_v59 }
 0x5f7   : > { %2210 = vmatpush.msrb.mxu1 %v3331_v29 }
 0x5f8   : > { %2183 = vmatpush.msrb.mxu0 %v2016_v58 }
 0x5f9   : > { %2212 = vmatpush.msrb.mxu1 %v3333_v51 }
 0x5fa   : > { %2187 = vmatpush.msrb.mxu0 %v2022_v3 }
 0x5fb   : > { %2214 = vmatpush.msrb.mxu1 %v3338_v1 }
 0x5fd   : > { %2216 = vmatpush.msrb.mxu1 %v3340_v14 }
 0x5ff   : > { %2218 = vmatpush.msrb.mxu1 %v3361_v20 }
 0x601   : > { %2220 = vmatpush.msrb.mxu1 %v3373_v41 }
 0x603   : > { %2222 = vmatpush.msrb.mxu1 %v3386_v44 }
 0x605   : > { %2224 = vmatpush.msrb.mxu1 %v3398_v49 }
 0x651   : > { %v1858_v21 = vpop.permute.xlu1 %1857 }
 0x652   : > { %1861 = vst.msk [vmem:[#allocation2] sm:$0xff] %vm1860_vm1, %v1858_v21 }
 0x659   : > { %v1864_v43 = vpop.permute.xlu0 %1863 }
 0x65a   : > { %1867 = vst.msk [vmem:[#allocation2] sm:$0xff] %vm1866_vm4, %v1864_v43 }
 0x661   : > { %v1868_v63 = vld [vmem:[#allocation2] sm:$0xff] }
 0x662   : > { %v1921_v24 = vand.u32 4294901760, %v1868_v63 }
 0x664   : > { %2027 = vmatmul.f32.vlgmr.msra.gmra.mxu1 %v1921_v24  ;;  %v1922_v19 = vsub.f32 %v1868_v63, %v1921_v24 }
 0x666   : > { %2081 = vmatmul.f32.vlgmr.msra.gmra.mxu2 %v1922_v19  ;;  %v1923_v27 = vand.u32 4294901760, %v1922_v19 }
 0x668   : > { %2120 = vmatmul.f32.vlgmr.msra.gmra.mxu3 %v1923_v27  ;;  %v1924_v60 = vsub.f32 %v1922_v19, %v1923_v27 }
 0x66a   : > { %v1925_v33 = vand.u32 4294901760, %v1924_v60 }
 0x66c   : > { %1926 = vmatmul.f32.vlgmr.msra.gmra.mxu0 %v1925_v33  ;;  %2226 = vmatmul.f32.vlgmr.msrb.gmra.mxu1 %v1921_v24 }
 0x674   : > { %2189 = vmatmul.f32.vlgmr.msrb.gmra.mxu0 %v1921_v24 }
 0x6e1   : > { %v2028_v4 = vpop.f32.mrf.mxu1 }
 0x6e9   : > { %v1927_v18 = vpop.f32.mrf.mxu0  ;;  %v2082_v9 = vpop.f32.mrf.mxu2 }
 0x6ea   : > { %v1928_v34 = vadd.f32 %v2409_v61, %v1927_v18  ;;  %v2227_v62 = vpop.f32.mrf.mxu1 }
 0x6eb   : > { %v2121_v7 = vpop.f32.mrf.mxu3 }
 0x6ec   : > { %v2029_v8 = vadd.f32 %v2028_v4, %v1928_v34 }
 0x6ee   : > { %v2083_v15 = vadd.f32 %v2082_v9, %v2029_v8 }
 0x6f0   : > { %v2122_v22 = vadd.f32 %v2121_v7, %v2083_v15 }
 0x6f1   : > { %v2190_v55 = vpop.f32.mrf.mxu0 }
 0x6f2   : > { %v2191_v10 = vadd.f32 %v2190_v55, %v2122_v22 }
 0x6f4   : > { %v2228_v17 = vadd.f32 %v2227_v62, %v2191_v10 }
 0x6f6   : > { %2230 = vst [vmem:[%s276_s16] sm:$0xff] %v2228_v17 }
 0x6f7   : > { %2513 = shalt.err (!%p2510_p8)
}
 0x6f8   : > { %2350 = dma.vmem_to_hbm [thread:$0]  (%p2640_p5), %s2245_s17, 128, %s2247_s18, %s2232_s25  }
 0x6f9 PF: > { %p2367_p9 = scmp.ge.s32.totalorder %s2556_s24, 2  ;;  %s2258_s10 = sand.u32 1, %s2544_s21  }
 0x6fa   : > { %s2259_s12 = scalar_lea.sflag [#allocation5], %s2258_s10 }
 0x6fb   : > { %p2360_p10 = pnand %p2367_p9, %p2644_p6 }
 0x6fd   : > { %p2361_p11 = pneg %p2360_p10 }
 0x6ff   : > { %2539 = dma.done.wait (%p2361_p11), %s2259_s12, 128  }
 0x700   : > { %2541 = vsyncadd (%p2361_p11), %s2259_s12, 4294967168  ;;  %p18_p12 = scmp.ge.s32.totalorder %s2627_s27, 4   ;;  %s3538_s21 = smov %s2548_s22 }
 0x701   : > { %s3539_s22 = smov %s2552_s23  ;;  %s3540_s23 = smov %s2638_s30 }
 0x702   : > { %s3541_s24 = smov %s2627_s27  ;;  %20 = sbr.rel (!%p18_p12) target bundleno = 5 (0x5), region = 88 }
 0x707   :  { %2265 = vsyncpa [#allocation4], 1 }
 0x708   :  { %2267 = vsyncpa [#allocation4 + $0x1], 1 }
 0x709   :  { %2268 = vsyncpa [#allocation7], 1 }
 0x70a   :  { %2269 = vsyncpa [#allocation5], 1 }
 0x70b   :  { %2271 = vsyncpa [#allocation5 + $0x1], 1 }

</bundles_post_ra>
